<compile_context>
chip_gen: v6e
topology: v6e:2x2x1
jax: 0.10.0
libtpu: 0.0.40
codegen_flags: <defaults>
</compile_context>

<pallas_src>
import functools

import numpy as np
import jax
import jax.numpy as jnp
from jax import lax
from jax.experimental import pallas as pl
from jax.experimental.pallas import tpu as pltpu


def _lstm_byte_kernel(T, Bp, H,
                      ids_f_ref, ids_b_ref, table_ref, whh_ref, h0_ref, c0_ref,
                      out_ref, xg_ref):
    N = T * Bp
    V2 = table_ref.shape[0]          # 512 = 2 * vocab (fwd rows | bwd rows)
    G = 8 * H                        # fwd+bwd gates, gate-major interleaved

    # ---- all per-timestep input gates via ONE one-hot matmul on the MXU ----
    # Row r = t*Bp + b gets: table[fwd_byte(t,b)] + table[256 + bwd_byte(t,b)],
    # i.e. fwd gate columns from time t and bwd gate columns from time T-1-t.
    col = lax.broadcasted_iota(jnp.int32, (N, V2), 1)
    onehot = ((ids_f_ref[...] == col).astype(jnp.float32)
              + ((ids_b_ref[...] + 256) == col).astype(jnp.float32))
    xg_ref[...] = jnp.dot(onehot, table_ref[...],
                          preferred_element_type=jnp.float32).reshape(T, Bp, G)

    # ---- constants hoisted out of the recurrence ---------------------------
    lane = lax.broadcasted_iota(jnp.int32, (Bp, G), 1)
    g_mask = (lane >= 4 * H) & (lane < 6 * H)          # tanh lanes (g gate)
    whh = whh_ref[...]                                 # (2H, 8H) block-diagonal
    h0 = jnp.broadcast_to(h0_ref[...], (Bp, 2 * H))    # [h0_fwd | h0_bwd]
    c0 = jnp.broadcast_to(c0_ref[...], (Bp, 2 * H))

    # ---- fused bidirectional recurrence: 1 matmul + 2 whole-tile EUP / step -
    def step(i, carry):
        h, c = carry
        pre = xg_ref[i] + jnp.dot(h, whh, preferred_element_type=jnp.float32)
        act = jnp.where(g_mask, jnp.tanh(pre), jax.nn.sigmoid(pre))
        i_g = act[:, 0 * H:2 * H]        # [i_f | i_b]
        f_g = act[:, 2 * H:4 * H]        # [f_f | f_b]
        g_g = act[:, 4 * H:6 * H]        # [g_f | g_b]
        o_g = act[:, 6 * H:8 * H]        # [o_f | o_b]
        c_new = f_g * c + i_g * g_g
        h_new = o_g * jnp.tanh(c_new)
        return h_new, c_new

    _, c_fin = lax.fori_loop(0, T, step, (h0, c0), unroll=True)

    pad = out_ref.shape[1] - 2 * H
    if pad > 0:                          # lane-dense full-tile store
        c_fin = jnp.concatenate(
            [c_fin, jnp.zeros((Bp, pad), jnp.float32)], axis=1)
    out_ref[...] = c_fin


def lstm_byte_embedding_forward(ids_tb, params):
    """ids_tb: (T, B) int32 zero-padded byte ids (time-major). Returns (B, 2H) f32."""
    T, B = ids_tb.shape
    H = params["emb"].shape[1]
    Bp = max(8, -(-B // 8) * 8)                     # pad batch to sublane multiple
    hp = lax.Precision.HIGHEST

    ids_pad = jnp.zeros((T, Bp), jnp.int32).at[:, :B].set(ids_tb.astype(jnp.int32))
    ids_f = ids_pad.reshape(T * Bp, 1)
    ids_b = ids_pad[::-1].reshape(T * Bp, 1)        # time-reversed for backward dir

    def interleave(fwd4h, bwd4h):
        # (R, 4H) in [i,f,g,o] order (x2) -> (R, 8H) [i_f,i_b,f_f,f_b,g_f,g_b,o_f,o_b]
        R = fwd4h.shape[0]
        return jnp.stack([fwd4h.reshape(R, 4, H), bwd4h.reshape(R, 4, H)],
                         axis=2).reshape(R, 8 * H)

    # Fused embedding -> input-gate tables (biases folded in).
    emb = params["emb"]
    tbl_f = (jnp.dot(emb, params["w_ih_f"].T, precision=hp)
             + params["b_ih_f"] + params["b_hh_f"])        # (256, 4H)
    tbl_b = (jnp.dot(emb, params["w_ih_b"].T, precision=hp)
             + params["b_ih_b"] + params["b_hh_b"])        # (256, 4H)
    z4 = jnp.zeros_like(tbl_f)
    table = jnp.concatenate([interleave(tbl_f, z4),
                             interleave(z4, tbl_b)], axis=0)   # (512, 8H)

    # Block-diagonal recurrent weights: [h_f | h_b] @ whh -> interleaved gates.
    zH = jnp.zeros((H, 4 * H), jnp.float32)
    whh = jnp.concatenate([interleave(params["w_hh_f"].T, zH),
                           interleave(zH, params["w_hh_b"].T)], axis=0)  # (2H, 8H)

    h0c = jnp.concatenate([params["h0"][0], params["h0"][1]]).reshape(1, 2 * H)
    c0c = jnp.concatenate([params["c0"][0], params["c0"][1]]).reshape(1, 2 * H)

    out_w = max(128, -(-2 * H // 128) * 128)        # lane-dense output width
    kernel = functools.partial(_lstm_byte_kernel, T, Bp, H)
    vmem = pl.BlockSpec(memory_space=pltpu.MemorySpace.VMEM)

    # TODO(synk): for very large T*B, chunk the one-hot/projection matmul over
    # rows (grid axis) to bound VMEM on v7x's 64 MiB; unnecessary at these sizes.
    out = pl.pallas_call(
        kernel,
        out_shape=jax.ShapeDtypeStruct((Bp, out_w), jnp.float32),
        in_specs=[vmem] * 6,
        out_specs=vmem,
        scratch_shapes=[pltpu.VMEM((T, Bp, 8 * H), jnp.float32)],
        compiler_params=pltpu.CompilerParams(vmem_limit_bytes=32 * 1024 * 1024),
    )(ids_f, ids_b, table, whh, h0c, c0c)
    return out[:B, :2 * H]


def reference_forward(ids_tb, params):
    """Pure-JAX reference replicating nn.LSTM(bidirectional) + final cell concat."""
    T, B = ids_tb.shape
    H = params["emb"].shape[1]
    x = params["emb"][ids_tb]  # (T, B, H)

    def run(wih, whh, b_ih, b_hh, h0, c0, reverse):
        h = jnp.broadcast_to(h0, (B, H))
        c = jnp.broadcast_to(c0, (B, H))
        order = range(T - 1, -1, -1) if reverse else range(T)
        for t in order:
            g = x[t] @ wih.T + h @ whh.T + b_ih + b_hh
            i = jax.nn.sigmoid(g[:, :H])
            f = jax.nn.sigmoid(g[:, H:2 * H])
            gg = jnp.tanh(g[:, 2 * H:3 * H])
            o = jax.nn.sigmoid(g[:, 3 * H:])
            c = f * c + i * gg
            h = o * jnp.tanh(c)
        return c

    c_f = run(params["w_ih_f"], params["w_hh_f"], params["b_ih_f"],
              params["b_hh_f"], params["h0"][0], params["c0"][0], False)
    c_b = run(params["w_ih_b"], params["w_hh_b"], params["b_ih_b"],
              params["b_hh_b"], params["h0"][1], params["c0"][1], True)
    return jnp.concatenate([c_f, c_b], axis=1)


def init_params(key, emb_dim):
    H = emb_dim
    ks = jax.random.split(key, 12)
    bound = 1.0 / np.sqrt(H)
    u = lambda k, shape: jax.random.uniform(k, shape, jnp.float32, -bound, bound)
    return {
        "emb": jax.random.normal(ks[0], (256, H), jnp.float32),   # nn.Embedding ~ N(0,1)
        "w_ih_f": u(ks[1], (4 * H, H)),
        "w_hh_f": u(ks[2], (4 * H, H)),
        "b_ih_f": u(ks[3], (4 * H,)),
        "b_hh_f": u(ks[4], (4 * H,)),
        "w_ih_b": u(ks[5], (4 * H, H)),
        "w_hh_b": u(ks[6], (4 * H, H)),
        "b_ih_b": u(ks[7], (4 * H,)),
        "b_hh_b": u(ks[8], (4 * H,)),
        "h0": jax.random.normal(ks[9], (2, H), jnp.float32),
        "c0": jax.random.normal(ks[10], (2, H), jnp.float32),
    }


if __name__ == "__main__":
    # Emulate the module's pad_sequence(bytearray(w.encode('utf-8'))) glue.
    sentence = ["hello", "tpu", "pallas!"]
    byte_seqs = [list(w.encode("utf-8")) for w in sentence]
    B = len(byte_seqs)
    T = max(len(s) for s in byte_seqs)
    ids_bt = np.zeros((B, T), dtype=np.int32)           # zero-padded, like pad_sequence
    for b, s in enumerate(byte_seqs):
        ids_bt[b, :len(s)] = s
    ids_tb = jnp.asarray(ids_bt.T)                      # time-major (T, B)

    emb_dim = 32                                        # small hidden size for the test
    params = init_params(jax.random.PRNGKey(0), emb_dim)

    out = lstm_byte_embedding_forward(ids_tb, params)
    out = jax.block_until_ready(out)

    ref = jax.block_until_ready(reference_forward(ids_tb, params))
    assert out.shape == (B, 2 * emb_dim)
    np.testing.assert_allclose(np.asarray(out), np.asarray(ref), rtol=1e-4, atol=1e-4)

    print("KERNEL_OK")
</pallas_src>

<mosaic_0001>
module attributes {stable_mosaic.version = 11 : i64} {
  func.func @_lstm_byte_kernel(%arg0: memref<56x1xi32, #tpu.memory_space<vmem>>, %arg1: memref<56x1xi32, #tpu.memory_space<vmem>>, %arg2: memref<512x256xf32, #tpu.memory_space<vmem>>, %arg3: memref<64x256xf32, #tpu.memory_space<vmem>>, %arg4: memref<1x64xf32, #tpu.memory_space<vmem>>, %arg5: memref<1x64xf32, #tpu.memory_space<vmem>>, %arg6: memref<8x128xf32, #tpu.memory_space<vmem>>, %arg7: memref<7x8x256xf32, #tpu.memory_space<vmem>>) attributes {dimension_semantics = [], scalar_prefetch = 0 : i64, scratch_operands = 1 : i64, tpu.core_type = #tpu.core_type<tc>} {
    %0 = tpu.iota {dimensions = array<i32: 1>} : vector<56x512xi32>
    %c0 = arith.constant 0 : index
    %c0_0 = arith.constant 0 : index
    %1 = vector.load %arg0[%c0, %c0_0] : memref<56x1xi32, #tpu.memory_space<vmem>>, vector<56x1xi32>
    %2 = vector.broadcast %1 : vector<56x1xi32> to vector<56x512xi32>
    %3 = arith.cmpi eq, %2, %0 : vector<56x512xi32>
    %4 = arith.extui %3 : vector<56x512xi1> to vector<56x512xi32>
    %5 = arith.sitofp %4 : vector<56x512xi32> to vector<56x512xf32>
    %c0_1 = arith.constant 0 : index
    %c0_2 = arith.constant 0 : index
    %6 = vector.load %arg1[%c0_1, %c0_2] : memref<56x1xi32, #tpu.memory_space<vmem>>, vector<56x1xi32>
    %c256_i32 = arith.constant 256 : i32
    %7 = vector.broadcast %c256_i32 : i32 to vector<56x1xi32>
    %8 = arith.addi %6, %7 : vector<56x1xi32>
    %9 = vector.broadcast %8 : vector<56x1xi32> to vector<56x512xi32>
    %10 = arith.cmpi eq, %9, %0 : vector<56x512xi32>
    %11 = arith.extui %10 : vector<56x512xi1> to vector<56x512xi32>
    %12 = arith.sitofp %11 : vector<56x512xi32> to vector<56x512xf32>
    %13 = arith.addf %5, %12 : vector<56x512xf32>
    %c0_3 = arith.constant 0 : index
    %c0_4 = arith.constant 0 : index
    %14 = vector.load %arg2[%c0_3, %c0_4] : memref<512x256xf32, #tpu.memory_space<vmem>>, vector<512x256xf32>
    %cst = arith.constant dense<0.000000e+00> : vector<56x256xf32>
    %15 = tpu.matmul %13, %14, %cst {dimension_numbers = #tpu.dot_dimension_numbers<[1], [0], [0], [1], [0, 0, 1, 1], [], []>} : vector<56x512xf32>, vector<512x256xf32>, vector<56x256xf32> -> vector<56x256xf32>
    %16 = vector.shape_cast %15 : vector<56x256xf32> to vector<7x8x256xf32>
    %c0_5 = arith.constant 0 : index
    %c0_6 = arith.constant 0 : index
    %c0_7 = arith.constant 0 : index
    %17 = vector.load %arg7[%c0_5, %c0_6, %c0_7] : memref<7x8x256xf32, #tpu.memory_space<vmem>>, vector<7x8x256xf32>
    tpu.vector_store %arg7[%c0_5, %c0_6, %c0_7], %16 {strides = array<i32>} : memref<7x8x256xf32, #tpu.memory_space<vmem>>, vector<7x8x256xf32>,
    %18 = tpu.iota {dimensions = array<i32: 1>} : vector<8x256xi32>
    %c128_i32 = arith.constant 128 : i32
    %19 = vector.broadcast %c128_i32 : i32 to vector<8x256xi32>
    %20 = arith.cmpi sge, %18, %19 : vector<8x256xi32>
    %c192_i32 = arith.constant 192 : i32
    %21 = vector.broadcast %c192_i32 : i32 to vector<8x256xi32>
    %22 = arith.cmpi slt, %18, %21 : vector<8x256xi32>
    %23 = arith.andi %20, %22 : vector<8x256xi1>
    %c0_8 = arith.constant 0 : index
    %c0_9 = arith.constant 0 : index
    %24 = vector.load %arg3[%c0_8, %c0_9] : memref<64x256xf32, #tpu.memory_space<vmem>>, vector<64x256xf32>
    %c0_10 = arith.constant 0 : index
    %c0_11 = arith.constant 0 : index
    %25 = vector.load %arg4[%c0_10, %c0_11] : memref<1x64xf32, #tpu.memory_space<vmem>>, vector<1x64xf32>
    %26 = vector.shape_cast %25 : vector<1x64xf32> to vector<1x64xf32>
    %27 = vector.broadcast %26 : vector<1x64xf32> to vector<8x64xf32>
    %c0_12 = arith.constant 0 : index
    %c0_13 = arith.constant 0 : index
    %28 = vector.load %arg5[%c0_12, %c0_13] : memref<1x64xf32, #tpu.memory_space<vmem>>, vector<1x64xf32>
    %29 = vector.shape_cast %28 : vector<1x64xf32> to vector<1x64xf32>
    %30 = vector.broadcast %29 : vector<1x64xf32> to vector<8x64xf32>
    %c0_i32 = arith.constant 0 : i32
    %31 = arith.index_cast %c0_i32 : i32 to index
    %c0_14 = arith.constant 0 : index
    %c0_15 = arith.constant 0 : index
    %32 = vector.load %arg7[%31, %c0_14, %c0_15] : memref<7x8x256xf32, #tpu.memory_space<vmem>>, vector<1x8x256xf32>
    %33 = vector.shape_cast %32 : vector<1x8x256xf32> to vector<8x256xf32>
    %cst_16 = arith.constant dense<0.000000e+00> : vector<8x256xf32>
    %34 = tpu.matmul %27, %24, %cst_16 {dimension_numbers = #tpu.dot_dimension_numbers<[1], [0], [0], [1], [0, 0, 1, 1], [], []>} : vector<8x64xf32>, vector<64x256xf32>, vector<8x256xf32> -> vector<8x256xf32>
    %35 = arith.addf %33, %34 : vector<8x256xf32>
    %36 = math.tanh %35 : vector<8x256xf32>
    %37 = arith.negf %35 : vector<8x256xf32>
    %38 = math.exp %37 : vector<8x256xf32>
    %cst_17 = arith.constant 1.000000e+00 : f32
    %39 = vector.broadcast %cst_17 : f32 to vector<8x256xf32>
    %40 = arith.addf %39, %38 : vector<8x256xf32>
    %41 = arith.divf %39, %40 : vector<8x256xf32>
    %42 = arith.select %23, %36, %41 : vector<8x256xi1>, vector<8x256xf32>
    %43 = vector.extract_strided_slice %42 {offsets = [0, 0], sizes = [8, 64], strides = [1, 1]} : vector<8x256xf32> to vector<8x64xf32>
    %44 = vector.extract_strided_slice %42 {offsets = [0, 64], sizes = [8, 64], strides = [1, 1]} : vector<8x256xf32> to vector<8x64xf32>
    %45 = vector.extract_strided_slice %42 {offsets = [0, 128], sizes = [8, 64], strides = [1, 1]} : vector<8x256xf32> to vector<8x64xf32>
    %46 = vector.extract_strided_slice %42 {offsets = [0, 192], sizes = [8, 64], strides = [1, 1]} : vector<8x256xf32> to vector<8x64xf32>
    %47 = arith.mulf %44, %30 : vector<8x64xf32>
    %48 = arith.mulf %43, %45 : vector<8x64xf32>
    %49 = arith.addf %47, %48 : vector<8x64xf32>
    %50 = math.tanh %49 : vector<8x64xf32>
    %51 = arith.mulf %46, %50 : vector<8x64xf32>
    %c1_i32 = arith.constant 1 : i32
    %52 = arith.index_cast %c1_i32 : i32 to index
    %c0_18 = arith.constant 0 : index
    %c0_19 = arith.constant 0 : index
    %53 = vector.load %arg7[%52, %c0_18, %c0_19] : memref<7x8x256xf32, #tpu.memory_space<vmem>>, vector<1x8x256xf32>
    %54 = vector.shape_cast %53 : vector<1x8x256xf32> to vector<8x256xf32>
    %cst_20 = arith.constant dense<0.000000e+00> : vector<8x256xf32>
    %55 = tpu.matmul %51, %24, %cst_20 {dimension_numbers = #tpu.dot_dimension_numbers<[1], [0], [0], [1], [0, 0, 1, 1], [], []>} : vector<8x64xf32>, vector<64x256xf32>, vector<8x256xf32> -> vector<8x256xf32>
    %56 = arith.addf %54, %55 : vector<8x256xf32>
    %57 = math.tanh %56 : vector<8x256xf32>
    %58 = arith.negf %56 : vector<8x256xf32>
    %59 = math.exp %58 : vector<8x256xf32>
    %cst_21 = arith.constant 1.000000e+00 : f32
    %60 = vector.broadcast %cst_21 : f32 to vector<8x256xf32>
    %61 = arith.addf %60, %59 : vector<8x256xf32>
    %62 = arith.divf %60, %61 : vector<8x256xf32>
    %63 = arith.select %23, %57, %62 : vector<8x256xi1>, vector<8x256xf32>
    %64 = vector.extract_strided_slice %63 {offsets = [0, 0], sizes = [8, 64], strides = [1, 1]} : vector<8x256xf32> to vector<8x64xf32>
    %65 = vector.extract_strided_slice %63 {offsets = [0, 64], sizes = [8, 64], strides = [1, 1]} : vector<8x256xf32> to vector<8x64xf32>
    %66 = vector.extract_strided_slice %63 {offsets = [0, 128], sizes = [8, 64], strides = [1, 1]} : vector<8x256xf32> to vector<8x64xf32>
    %67 = vector.extract_strided_slice %63 {offsets = [0, 192], sizes = [8, 64], strides = [1, 1]} : vector<8x256xf32> to vector<8x64xf32>
    %68 = arith.mulf %65, %49 : vector<8x64xf32>
    %69 = arith.mulf %64, %66 : vector<8x64xf32>
    %70 = arith.addf %68, %69 : vector<8x64xf32>
    %71 = math.tanh %70 : vector<8x64xf32>
    %72 = arith.mulf %67, %71 : vector<8x64xf32>
    %c2_i32 = arith.constant 2 : i32
    %73 = arith.index_cast %c2_i32 : i32 to index
    %c0_22 = arith.constant 0 : index
    %c0_23 = arith.constant 0 : index
    %74 = vector.load %arg7[%73, %c0_22, %c0_23] : memref<7x8x256xf32, #tpu.memory_space<vmem>>, vector<1x8x256xf32>
    %75 = vector.shape_cast %74 : vector<1x8x256xf32> to vector<8x256xf32>
    %cst_24 = arith.constant dense<0.000000e+00> : vector<8x256xf32>
    %76 = tpu.matmul %72, %24, %cst_24 {dimension_numbers = #tpu.dot_dimension_numbers<[1], [0], [0], [1], [0, 0, 1, 1], [], []>} : vector<8x64xf32>, vector<64x256xf32>, vector<8x256xf32> -> vector<8x256xf32>
    %77 = arith.addf %75, %76 : vector<8x256xf32>
    %78 = math.tanh %77 : vector<8x256xf32>
    %79 = arith.negf %77 : vector<8x256xf32>
    %80 = math.exp %79 : vector<8x256xf32>
    %cst_25 = arith.constant 1.000000e+00 : f32
    %81 = vector.broadcast %cst_25 : f32 to vector<8x256xf32>
    %82 = arith.addf %81, %80 : vector<8x256xf32>
    %83 = arith.divf %81, %82 : vector<8x256xf32>
    %84 = arith.select %23, %78, %83 : vector<8x256xi1>, vector<8x256xf32>
    %85 = vector.extract_strided_slice %84 {offsets = [0, 0], sizes = [8, 64], strides = [1, 1]} : vector<8x256xf32> to vector<8x64xf32>
    %86 = vector.extract_strided_slice %84 {offsets = [0, 64], sizes = [8, 64], strides = [1, 1]} : vector<8x256xf32> to vector<8x64xf32>
    %87 = vector.extract_strided_slice %84 {offsets = [0, 128], sizes = [8, 64], strides = [1, 1]} : vector<8x256xf32> to vector<8x64xf32>
    %88 = vector.extract_strided_slice %84 {offsets = [0, 192], sizes = [8, 64], strides = [1, 1]} : vector<8x256xf32> to vector<8x64xf32>
    %89 = arith.mulf %86, %70 : vector<8x64xf32>
    %90 = arith.mulf %85, %87 : vector<8x64xf32>
    %91 = arith.addf %89, %90 : vector<8x64xf32>
    %92 = math.tanh %91 : vector<8x64xf32>
    %93 = arith.mulf %88, %92 : vector<8x64xf32>
    %c3_i32 = arith.constant 3 : i32
    %94 = arith.index_cast %c3_i32 : i32 to index
    %c0_26 = arith.constant 0 : index
    %c0_27 = arith.constant 0 : index
    %95 = vector.load %arg7[%94, %c0_26, %c0_27] : memref<7x8x256xf32, #tpu.memory_space<vmem>>, vector<1x8x256xf32>
    %96 = vector.shape_cast %95 : vector<1x8x256xf32> to vector<8x256xf32>
    %cst_28 = arith.constant dense<0.000000e+00> : vector<8x256xf32>
    %97 = tpu.matmul %93, %24, %cst_28 {dimension_numbers = #tpu.dot_dimension_numbers<[1], [0], [0], [1], [0, 0, 1, 1], [], []>} : vector<8x64xf32>, vector<64x256xf32>, vector<8x256xf32> -> vector<8x256xf32>
    %98 = arith.addf %96, %97 : vector<8x256xf32>
    %99 = math.tanh %98 : vector<8x256xf32>
    %100 = arith.negf %98 : vector<8x256xf32>
    %101 = math.exp %100 : vector<8x256xf32>
    %cst_29 = arith.constant 1.000000e+00 : f32
    %102 = vector.broadcast %cst_29 : f32 to vector<8x256xf32>
    %103 = arith.addf %102, %101 : vector<8x256xf32>
    %104 = arith.divf %102, %103 : vector<8x256xf32>
    %105 = arith.select %23, %99, %104 : vector<8x256xi1>, vector<8x256xf32>
    %106 = vector.extract_strided_slice %105 {offsets = [0, 0], sizes = [8, 64], strides = [1, 1]} : vector<8x256xf32> to vector<8x64xf32>
    %107 = vector.extract_strided_slice %105 {offsets = [0, 64], sizes = [8, 64], strides = [1, 1]} : vector<8x256xf32> to vector<8x64xf32>
    %108 = vector.extract_strided_slice %105 {offsets = [0, 128], sizes = [8, 64], strides = [1, 1]} : vector<8x256xf32> to vector<8x64xf32>
    %109 = vector.extract_strided_slice %105 {offsets = [0, 192], sizes = [8, 64], strides = [1, 1]} : vector<8x256xf32> to vector<8x64xf32>
    %110 = arith.mulf %107, %91 : vector<8x64xf32>
    %111 = arith.mulf %106, %108 : vector<8x64xf32>
    %112 = arith.addf %110, %111 : vector<8x64xf32>
    %113 = math.tanh %112 : vector<8x64xf32>
    %114 = arith.mulf %109, %113 : vector<8x64xf32>
    %c4_i32 = arith.constant 4 : i32
    %115 = arith.index_cast %c4_i32 : i32 to index
    %c0_30 = arith.constant 0 : index
    %c0_31 = arith.constant 0 : index
    %116 = vector.load %arg7[%115, %c0_30, %c0_31] : memref<7x8x256xf32, #tpu.memory_space<vmem>>, vector<1x8x256xf32>
    %117 = vector.shape_cast %116 : vector<1x8x256xf32> to vector<8x256xf32>
    %cst_32 = arith.constant dense<0.000000e+00> : vector<8x256xf32>
    %118 = tpu.matmul %114, %24, %cst_32 {dimension_numbers = #tpu.dot_dimension_numbers<[1], [0], [0], [1], [0, 0, 1, 1], [], []>} : vector<8x64xf32>, vector<64x256xf32>, vector<8x256xf32> -> vector<8x256xf32>
    %119 = arith.addf %117, %118 : vector<8x256xf32>
    %120 = math.tanh %119 : vector<8x256xf32>
    %121 = arith.negf %119 : vector<8x256xf32>
    %122 = math.exp %121 : vector<8x256xf32>
    %cst_33 = arith.constant 1.000000e+00 : f32
    %123 = vector.broadcast %cst_33 : f32 to vector<8x256xf32>
    %124 = arith.addf %123, %122 : vector<8x256xf32>
    %125 = arith.divf %123, %124 : vector<8x256xf32>
    %126 = arith.select %23, %120, %125 : vector<8x256xi1>, vector<8x256xf32>
    %127 = vector.extract_strided_slice %126 {offsets = [0, 0], sizes = [8, 64], strides = [1, 1]} : vector<8x256xf32> to vector<8x64xf32>
    %128 = vector.extract_strided_slice %126 {offsets = [0, 64], sizes = [8, 64], strides = [1, 1]} : vector<8x256xf32> to vector<8x64xf32>
    %129 = vector.extract_strided_slice %126 {offsets = [0, 128], sizes = [8, 64], strides = [1, 1]} : vector<8x256xf32> to vector<8x64xf32>
    %130 = vector.extract_strided_slice %126 {offsets = [0, 192], sizes = [8, 64], strides = [1, 1]} : vector<8x256xf32> to vector<8x64xf32>
    %131 = arith.mulf %128, %112 : vector<8x64xf32>
    %132 = arith.mulf %127, %129 : vector<8x64xf32>
    %133 = arith.addf %131, %132 : vector<8x64xf32>
    %134 = math.tanh %133 : vector<8x64xf32>
    %135 = arith.mulf %130, %134 : vector<8x64xf32>
    %c5_i32 = arith.constant 5 : i32
    %136 = arith.index_cast %c5_i32 : i32 to index
    %c0_34 = arith.constant 0 : index
    %c0_35 = arith.constant 0 : index
    %137 = vector.load %arg7[%136, %c0_34, %c0_35] : memref<7x8x256xf32, #tpu.memory_space<vmem>>, vector<1x8x256xf32>
    %138 = vector.shape_cast %137 : vector<1x8x256xf32> to vector<8x256xf32>
    %cst_36 = arith.constant dense<0.000000e+00> : vector<8x256xf32>
    %139 = tpu.matmul %135, %24, %cst_36 {dimension_numbers = #tpu.dot_dimension_numbers<[1], [0], [0], [1], [0, 0, 1, 1], [], []>} : vector<8x64xf32>, vector<64x256xf32>, vector<8x256xf32> -> vector<8x256xf32>
    %140 = arith.addf %138, %139 : vector<8x256xf32>
    %141 = math.tanh %140 : vector<8x256xf32>
    %142 = arith.negf %140 : vector<8x256xf32>
    %143 = math.exp %142 : vector<8x256xf32>
    %cst_37 = arith.constant 1.000000e+00 : f32
    %144 = vector.broadcast %cst_37 : f32 to vector<8x256xf32>
    %145 = arith.addf %144, %143 : vector<8x256xf32>
    %146 = arith.divf %144, %145 : vector<8x256xf32>
    %147 = arith.select %23, %141, %146 : vector<8x256xi1>, vector<8x256xf32>
    %148 = vector.extract_strided_slice %147 {offsets = [0, 0], sizes = [8, 64], strides = [1, 1]} : vector<8x256xf32> to vector<8x64xf32>
    %149 = vector.extract_strided_slice %147 {offsets = [0, 64], sizes = [8, 64], strides = [1, 1]} : vector<8x256xf32> to vector<8x64xf32>
    %150 = vector.extract_strided_slice %147 {offsets = [0, 128], sizes = [8, 64], strides = [1, 1]} : vector<8x256xf32> to vector<8x64xf32>
    %151 = vector.extract_strided_slice %147 {offsets = [0, 192], sizes = [8, 64], strides = [1, 1]} : vector<8x256xf32> to vector<8x64xf32>
    %152 = arith.mulf %149, %133 : vector<8x64xf32>
    %153 = arith.mulf %148, %150 : vector<8x64xf32>
    %154 = arith.addf %152, %153 : vector<8x64xf32>
    %155 = math.tanh %154 : vector<8x64xf32>
    %156 = arith.mulf %151, %155 : vector<8x64xf32>
    %c6_i32 = arith.constant 6 : i32
    %157 = arith.index_cast %c6_i32 : i32 to index
    %c0_38 = arith.constant 0 : index
    %c0_39 = arith.constant 0 : index
    %158 = vector.load %arg7[%157, %c0_38, %c0_39] : memref<7x8x256xf32, #tpu.memory_space<vmem>>, vector<1x8x256xf32>
    %159 = vector.shape_cast %158 : vector<1x8x256xf32> to vector<8x256xf32>
    %cst_40 = arith.constant dense<0.000000e+00> : vector<8x256xf32>
    %160 = tpu.matmul %156, %24, %cst_40 {dimension_numbers = #tpu.dot_dimension_numbers<[1], [0], [0], [1], [0, 0, 1, 1], [], []>} : vector<8x64xf32>, vector<64x256xf32>, vector<8x256xf32> -> vector<8x256xf32>
    %161 = arith.addf %159, %160 : vector<8x256xf32>
    %162 = math.tanh %161 : vector<8x256xf32>
    %163 = arith.negf %161 : vector<8x256xf32>
    %164 = math.exp %163 : vector<8x256xf32>
    %cst_41 = arith.constant 1.000000e+00 : f32
    %165 = vector.broadcast %cst_41 : f32 to vector<8x256xf32>
    %166 = arith.addf %165, %164 : vector<8x256xf32>
    %167 = arith.divf %165, %166 : vector<8x256xf32>
    %168 = arith.select %23, %162, %167 : vector<8x256xi1>, vector<8x256xf32>
    %169 = vector.extract_strided_slice %168 {offsets = [0, 0], sizes = [8, 64], strides = [1, 1]} : vector<8x256xf32> to vector<8x64xf32>
    %170 = vector.extract_strided_slice %168 {offsets = [0, 64], sizes = [8, 64], strides = [1, 1]} : vector<8x256xf32> to vector<8x64xf32>
    %171 = vector.extract_strided_slice %168 {offsets = [0, 128], sizes = [8, 64], strides = [1, 1]} : vector<8x256xf32> to vector<8x64xf32>
    %172 = vector.extract_strided_slice %168 {offsets = [0, 192], sizes = [8, 64], strides = [1, 1]} : vector<8x256xf32> to vector<8x64xf32>
    %173 = arith.mulf %170, %154 : vector<8x64xf32>
    %174 = arith.mulf %169, %171 : vector<8x64xf32>
    %175 = arith.addf %173, %174 : vector<8x64xf32>
    %176 = math.tanh %175 : vector<8x64xf32>
    %177 = arith.mulf %172, %176 : vector<8x64xf32>
    %c7_i32 = arith.constant 7 : i32
    %cst_42 = arith.constant 0.000000e+00 : f32
    %178 = vector.broadcast %cst_42 : f32 to vector<8x64xf32>
    %179 = tpu.concatenate %175, %178 in 1 : vector<8x64xf32>, vector<8x64xf32> -> vector<8x128xf32>
    %c0_43 = arith.constant 0 : index
    %c0_44 = arith.constant 0 : index
    %180 = vector.load %arg6[%c0_43, %c0_44] : memref<8x128xf32, #tpu.memory_space<vmem>>, vector<8x128xf32>
    tpu.vector_store %arg6[%c0_43, %c0_44], %179 {strides = array<i32>} : memref<8x128xf32, #tpu.memory_space<vmem>>, vector<8x128xf32>,
    return
  }
}

</mosaic_0001>

<bundles_post_ra>
// kernel: tpu_custom_call.1
= control target key start
LH: loop header
LB: loop body
LE: loop exit
PB: predicated region body
PF: predicated region fallthrough
CT: control target
= control target key end

     0   :  { %11 = vsyncpa [#allocation4], 0  ;;  %s2354_s0 = inlined_call_operand.vmem [shape: s32[56,1], index: 0, kind: input, shape index: {}]   ;;  %s2355_s1 = inlined_call_operand.vmem [shape: s32[56,1], index: 1, kind: input, shape index: {}]   ;;  %s2356_s2 = inlined_call_operand.hbm [shape: f32[512,256], index: 2, kind: input, shape index: {}]   ;;  %s2357_s3 = inlined_call_operand.hbm [shape: f32[64,256], index: 3, kind: input, shape index: {}]   ;;  %s2358_s4 = inlined_call_operand.vmem [shape: f32[1,64], index: 4, kind: input, shape index: {}]   ;;  %s2359_s5 = inlined_call_operand.vmem [shape: f32[1,64], index: 5, kind: input, shape index: {}]   ;;  %s2360_s6 = inlined_call_operand.hbm [shape: f32[8,128], index: 6, kind: output, shape index: {}]  }
   0x1   :  { %12 = vsyncpa [#allocation7], 0 }
   0x2   :  { %13 = vsyncpa [#allocation5], 0  ;;  %s1705_s21 = smov [#allocation3]  }
   0x3   :  { %s23_s22 = sshll.u32 %s1705_s21, 4  ;;  %s24_s22 = int_to_ptr.vmem [resolvable:$true] %s23_s22 }
   0x4   :  { %s1647_s23 = scalar_lea.vmem %s24_s22, 16384  ;;  %p1652_p1 = scmp.lt.s32.totalorder %s24_s22, %s24_s22 }
   0x5   :  { %p1648_p0 = scmp.ne.s32.totalorder %s24_s22, %s1647_s23  ;;  %p1653_p2 = scmp.lt.s32.totalorder %s1647_s23, %s1647_s23 }
   0x7   :  { %p1654_p3 = por %p1653_p2, %p1652_p1 }
   0x9   :  { %p1655_p4 = pnand %p1654_p3, %p1648_p0 }
   0xb   :  { %1658 = shalt.err (!%p1655_p4)
}
   0xc   :  { %s1706_s24 = smov 256   ;;  %s1707_s25 = smov 16  }
   0xd   :  { %29 = dma.hbm_to_vmem [thread:$0]  %s2356_s2, 16384, %s24_s22, [#allocation4], %s1706_s24, %s1706_s24, %s1707_s25  }
   0xe   :  { %s1708_s28 = smov [#allocation6]  }
   0xf   :  { %s35_s29 = sshll.u32 %s1708_s28, 4  ;;  %s36_s29 = int_to_ptr.vmem [resolvable:$true] %s35_s29 }
  0x10   :  { %s1667_s30 = scalar_lea.vmem %s36_s29, 2048  ;;  %p1672_p6 = scmp.lt.s32.totalorder %s36_s29, %s36_s29 }
  0x11   :  { %p1668_p5 = scmp.ne.s32.totalorder %s36_s29, %s1667_s30  ;;  %p1673_p7 = scmp.lt.s32.totalorder %s1667_s30, %s1667_s30 }
  0x13   :  { %p1674_p8 = por %p1673_p7, %p1672_p6 }
  0x15   :  { %p1675_p9 = pnand %p1674_p8, %p1668_p5 }
  0x17   :  { %1678 = shalt.err (!%p1675_p9)
}
  0x18   :  { %41 = dma.hbm_to_vmem [thread:$0]  %s2357_s3, 2048, %s36_s29, [#allocation7], %s1706_s24, %s1706_s24, %s1707_s25  }
  0x19   :  { %1699 = dma.done.wait [#allocation4], 16384  }
  0x1a   :  { %1700 = vsyncadd [#allocation4], 4294950912 }
  0x1b   :  { %1701 = dma.done.wait [#allocation7], 2048  }
  0x1c   :  { %1702 = vsyncadd [#allocation7], 4294965248  ;;  %v1709_v0 = vmov 0   ;;  %v58_v1 = vld [vmem:[%s2354_s0 + $0x8] sm:$0xff]  ;;  %v57_v2 = vld [vmem:[%s2354_s0] sm:$0xff]  ;;  %s1710_s10 = smov 64  }
  0x1d   :  { %1556 = vset.pattern.permute.xlu1 %v1709_v0  ;;  %1555 = vset.pattern.permute.xlu0 %v1709_v0  ;;  %v170_v3 = vld [vmem:[%s2355_s1 + $0x8] sm:$0xff]  ;;  %v169_v5 = vld [vmem:[%s2355_s1] sm:$0xff]  ;;  %v171_v7 = vld [vmem:[%s2355_s1 + $0x10] sm:$0xff] }
  0x1e   :  { %68 = vperm.xlu1 %1556, %v58_v1   ;;  %65 = vperm.xlu0 %1555, %v57_v2   ;;  %v177_v4 = vadd.s32 256, %v170_v3  ;;  %v176_v6 = vadd.s32 256, %v169_v5  ;;  %v59_v8 = vld [vmem:[%s2354_s0 + $0x10] sm:$0xff]  ;;  %v347_v9 = vld [vmem:[#allocation3 + $0xf8] sm:$0xff]  ;;  %v178_v10 = vadd.s32 256, %v171_v7  ;;  %v345_v13 = vld [vmem:[#allocation3 + $0xe8] sm:$0xff] }
  0x1f   :  { %v346_v11 = vld [vmem:[#allocation3 + $0xf0] sm:$0xff]  ;;  %v411_v12 = vld [vmem:[#allocation3 + $0x2f8] sm:$0xff]  ;;  %444 = vmatprep.subr.mxu0 %v347_v9  ;;  %v409_v16 = vld [vmem:[#allocation3 + $0x2e8] sm:$0xff] }
  0x20   :  { %v172_v14 = vld [vmem:[%s2355_s1 + $0x18] sm:$0xff]  ;;  %551 = vmatprep.subr.mxu1 %v411_v12  ;;  %v410_v15 = vld [vmem:[#allocation3 + $0x2f0] sm:$0xff]  ;;  %445 = vmatpush1.msra.mxu0 %v346_v11  ;;  %v344_v17 = vld [vmem:[#allocation3 + $0xe0] sm:$0xff] }
  0x21   :  { %552 = vmatpush1.msra.mxu1 %v410_v15  ;;  %v408_v18 = vld [vmem:[#allocation3 + $0x2e0] sm:$0xff]  ;;  %446 = vmatprep.subr.mxu0 %v345_v13  ;;  %v343_v19 = vld [vmem:[#allocation3 + $0xd8] sm:$0xff]  ;;  %v179_v21 = vadd.s32 256, %v172_v14  ;;  %v342_v22 = vld [vmem:[#allocation3 + $0xd0] sm:$0xff] }
  0x22   :  { %187 = vperm.xlu1 %1556, %v177_v4   ;;  %184 = vperm.xlu0 %1555, %v176_v6   ;;  %v407_v20 = vld [vmem:[#allocation3 + $0x2d8] sm:$0xff]  ;;  %v406_v23 = vld [vmem:[#allocation3 + $0x2d0] sm:$0xff]  ;;  %v173_v25 = vld [vmem:[%s2355_s1 + $0x20] sm:$0xff] }
  0x23   :  { %553 = vmatprep.subr.mxu1 %v409_v16  ;;  %v60_v24 = vld [vmem:[%s2354_s0 + $0x18] sm:$0xff]  ;;  %447 = vmatpush1.msra.mxu0 %v344_v17  ;;  %v341_v26 = vld [vmem:[#allocation3 + $0xc8] sm:$0xff]  ;;  %v340_v28 = vld [vmem:[#allocation3 + $0xc0] sm:$0xff]  ;;  %v180_v30 = vadd.s32 256, %v173_v25 }
  0x24   :  { %554 = vmatpush1.msra.mxu1 %v408_v18  ;;  %448 = vmatprep.subr.mxu0 %v343_v19  ;;  %v405_v27 = vld [vmem:[#allocation3 + $0x2c8] sm:$0xff]  ;;  %v404_v29 = vld [vmem:[#allocation3 + $0x2c0] sm:$0xff]  ;;  %v339_v31 = vld [vmem:[#allocation3 + $0xb8] sm:$0xff] }
  0x25   :  { %555 = vmatprep.subr.mxu1 %v407_v20  ;;  %449 = vmatpush1.msra.mxu0 %v342_v22  ;;  %v403_v32 = vld [vmem:[#allocation3 + $0x2b8] sm:$0xff]  ;;  %v61_v33 = vld [vmem:[%s2354_s0 + $0x20] sm:$0xff]  ;;  %v174_v34 = vld [vmem:[%s2355_s1 + $0x28] sm:$0xff] }
  0x26   :  { %190 = vperm.xlu1 %1556, %v178_v10   ;;  %71 = vperm.xlu0 %1555, %v59_v8   ;;  %v338_v35 = vld [vmem:[#allocation3 + $0xb0] sm:$0xff]  ;;  %v337_v37 = vld [vmem:[#allocation3 + $0xa8] sm:$0xff]  ;;  %v181_v39 = vadd.s32 256, %v174_v34  ;;  %v336_v40 = vld [vmem:[#allocation3 + $0xa0] sm:$0xff] }
  0x27   :  { %556 = vmatpush1.msra.mxu1 %v406_v23  ;;  %450 = vmatprep.subr.mxu0 %v341_v26  ;;  %v402_v36 = vld [vmem:[#allocation3 + $0x2b0] sm:$0xff]  ;;  %v401_v38 = vld [vmem:[#allocation3 + $0x2a8] sm:$0xff]  ;;  %v400_v41 = vld [vmem:[#allocation3 + $0x2a0] sm:$0xff] }
  0x28   :  { %557 = vmatprep.subr.mxu1 %v405_v27  ;;  %451 = vmatpush1.msra.mxu0 %v340_v28  ;;  %v62_v42 = vld [vmem:[%s2354_s0 + $0x28] sm:$0xff]  ;;  %v175_v43 = vld [vmem:[%s2355_s1 + $0x30] sm:$0xff]  ;;  %v335_v44 = vld [vmem:[#allocation3 + $0x98] sm:$0xff] }
  0x29   :  { %558 = vmatpush1.msra.mxu1 %v404_v29  ;;  %452 = vmatprep.subr.mxu0 %v339_v31  ;;  %v399_v45 = vld [vmem:[#allocation3 + $0x298] sm:$0xff]  ;;  %v334_v46 = vld [vmem:[#allocation3 + $0x90] sm:$0xff]  ;;  %v182_v48 = vadd.s32 256, %v175_v43  ;;  %v333_v49 = vld [vmem:[#allocation3 + $0x88] sm:$0xff] }
  0x2a   :  { %193 = vperm.xlu1 %1556, %v179_v21   ;;  %74 = vperm.xlu0 %1555, %v60_v24   ;;  %v398_v47 = vld [vmem:[#allocation3 + $0x290] sm:$0xff]  ;;  %v397_v50 = vld [vmem:[#allocation3 + $0x288] sm:$0xff]  ;;  %v332_v52 = vld [vmem:[#allocation3 + $0x80] sm:$0xff] }
  0x2b   :  { %559 = vmatprep.subr.mxu1 %v403_v32  ;;  %453 = vmatpush1.msra.mxu0 %v338_v35  ;;  %v63_v51 = vld [vmem:[%s2354_s0 + $0x30] sm:$0xff]  ;;  %v396_v53 = vld [vmem:[#allocation3 + $0x280] sm:$0xff]  ;;  %v331_v54 = vld [vmem:[#allocation3 + $0x78] sm:$0xff] }
  0x2c   :  { %560 = vmatpush1.msra.mxu1 %v402_v36  ;;  %454 = vmatprep.subr.mxu0 %v337_v37  ;;  %v395_v55 = vld [vmem:[#allocation3 + $0x278] sm:$0xff]  ;;  %v330_v56 = vld [vmem:[#allocation3 + $0x70] sm:$0xff]  ;;  %v329_v58 = vld [vmem:[#allocation3 + $0x68] sm:$0xff] }
  0x2d   :  { %561 = vmatprep.subr.mxu1 %v401_v38  ;;  %455 = vmatpush1.msra.mxu0 %v336_v40  ;;  %v394_v57 = vld [vmem:[#allocation3 + $0x270] sm:$0xff]  ;;  %v393_v59 = vld [vmem:[#allocation3 + $0x268] sm:$0xff]  ;;  %v328_v60 = vld [vmem:[#allocation3 + $0x60] sm:$0xff] }
  0x2e   :  { %196 = vperm.xlu1 %1556, %v180_v30   ;;  %77 = vperm.xlu0 %1555, %v61_v33   ;;  %v392_v61 = vld [vmem:[#allocation3 + $0x260] sm:$0xff]  ;;  %v327_v62 = vld [vmem:[#allocation3 + $0x58] sm:$0xff]  ;;  %v326_v0 = vld [vmem:[#allocation3 + $0x50] sm:$0xff] }
  0x2f   :  { %562 = vmatpush1.msra.mxu1 %v400_v41  ;;  %456 = vmatprep.subr.mxu0 %v335_v44  ;;  %v391_v63 = vld [vmem:[#allocation3 + $0x258] sm:$0xff]  ;;  %v390_v1 = vld [vmem:[#allocation3 + $0x250] sm:$0xff]  ;;  %v325_v2 = vld [vmem:[#allocation3 + $0x48] sm:$0xff] }
  0x30   :  { %563 = vmatprep.subr.mxu1 %v399_v45  ;;  %457 = vmatpush1.msra.mxu0 %v334_v46  ;;  %v389_v3 = vld [vmem:[#allocation3 + $0x248] sm:$0xff]  ;;  %v324_v4 = vld [vmem:[#allocation3 + $0x40] sm:$0xff]  ;;  %v323_v6 = vld [vmem:[#allocation3 + $0x38] sm:$0xff] }
  0x31   :  { %564 = vmatpush1.msra.mxu1 %v398_v47  ;;  %458 = vmatprep.subr.mxu0 %v333_v49  ;;  %v388_v5 = vld [vmem:[#allocation3 + $0x240] sm:$0xff]  ;;  %v387_v7 = vld [vmem:[#allocation3 + $0x238] sm:$0xff]  ;;  %v322_v8 = vld [vmem:[#allocation3 + $0x30] sm:$0xff] }
  0x32   :  { %199 = vperm.xlu1 %1556, %v181_v39   ;;  %80 = vperm.xlu0 %1555, %v62_v42   ;;  %v386_v9 = vld [vmem:[#allocation3 + $0x230] sm:$0xff]  ;;  %v321_v10 = vld [vmem:[#allocation3 + $0x28] sm:$0xff]  ;;  %v320_v12 = vld [vmem:[#allocation3 + $0x20] sm:$0xff] }
  0x33   :  { %565 = vmatprep.subr.mxu1 %v397_v50  ;;  %459 = vmatpush1.msra.mxu0 %v332_v52  ;;  %v385_v11 = vld [vmem:[#allocation3 + $0x228] sm:$0xff]  ;;  %v384_v13 = vld [vmem:[#allocation3 + $0x220] sm:$0xff]  ;;  %v319_v14 = vld [vmem:[#allocation3 + $0x18] sm:$0xff] }
  0x34   :  { %566 = vmatpush1.msra.mxu1 %v396_v53  ;;  %460 = vmatprep.subr.mxu0 %v331_v54  ;;  %v383_v15 = vld [vmem:[#allocation3 + $0x218] sm:$0xff]  ;;  %v318_v16 = vld [vmem:[#allocation3 + $0x10] sm:$0xff]  ;;  %v317_v18 = vld [vmem:[#allocation3 + $0x8] sm:$0xff] }
  0x35   :  { %567 = vmatprep.subr.mxu1 %v395_v55  ;;  %461 = vmatpush1.msra.mxu0 %v330_v56  ;;  %v382_v17 = vld [vmem:[#allocation3 + $0x210] sm:$0xff]  ;;  %v381_v19 = vld [vmem:[#allocation3 + $0x208] sm:$0xff]  ;;  %v316_v20 = vld [vmem:[#allocation3] sm:$0xff] }
  0x36   :  { %202 = vperm.xlu1 %1556, %v182_v48   ;;  %83 = vperm.xlu0 %1555, %v63_v51   ;;  %v380_v21 = vld [vmem:[#allocation3 + $0x200] sm:$0xff]  ;;  %v379_v22 = vld [vmem:[#allocation3 + $0x1f8] sm:$0xff]  ;;  %v378_v24 = vld [vmem:[#allocation3 + $0x1f0] sm:$0xff] }
  0x37   :  { %568 = vmatpush1.msra.mxu1 %v394_v57  ;;  %462 = vmatprep.subr.mxu0 %v329_v58  ;;  %v443_v23 = vld [vmem:[#allocation3 + $0x3f8] sm:$0xff]  ;;  %v442_v25 = vld [vmem:[#allocation3 + $0x3f0] sm:$0xff]  ;;  %v377_v26 = vld [vmem:[#allocation3 + $0x1e8] sm:$0xff] }
  0x38   :  { %569 = vmatprep.subr.mxu1 %v393_v59  ;;  %463 = vmatpush1.msra.mxu0 %v328_v60  ;;  %v441_v27 = vld [vmem:[#allocation3 + $0x3e8] sm:$0xff]  ;;  %v376_v28 = vld [vmem:[#allocation3 + $0x1e0] sm:$0xff]  ;;  %v375_v30 = vld [vmem:[#allocation3 + $0x1d8] sm:$0xff] }
  0x39   :  { %570 = vmatpush1.msra.mxu1 %v392_v61  ;;  %464 = vmatprep.subr.mxu0 %v327_v62  ;;  %v440_v29 = vld [vmem:[#allocation3 + $0x3e0] sm:$0xff]  ;;  %v439_v31 = vld [vmem:[#allocation3 + $0x3d8] sm:$0xff]  ;;  %v374_v32 = vld [vmem:[#allocation3 + $0x1d0] sm:$0xff] }
  0x3a   :  { %571 = vmatprep.subr.mxu1 %v391_v63  ;;  %465 = vmatpush1.msra.mxu0 %v326_v0  ;;  %v438_v33 = vld [vmem:[#allocation3 + $0x3d0] sm:$0xff]  ;;  %v373_v34 = vld [vmem:[#allocation3 + $0x1c8] sm:$0xff]  ;;  %v372_v36 = vld [vmem:[#allocation3 + $0x1c0] sm:$0xff] }
  0x3b   :  { %572 = vmatpush1.msra.mxu1 %v390_v1  ;;  %466 = vmatprep.subr.mxu0 %v325_v2  ;;  %v437_v35 = vld [vmem:[#allocation3 + $0x3c8] sm:$0xff]  ;;  %v436_v37 = vld [vmem:[#allocation3 + $0x3c0] sm:$0xff]  ;;  %v371_v38 = vld [vmem:[#allocation3 + $0x1b8] sm:$0xff] }
  0x3c   :  { %573 = vmatprep.subr.mxu1 %v389_v3  ;;  %467 = vmatpush1.msra.mxu0 %v324_v4  ;;  %v435_v39 = vld [vmem:[#allocation3 + $0x3b8] sm:$0xff]  ;;  %v370_v40 = vld [vmem:[#allocation3 + $0x1b0] sm:$0xff]  ;;  %v369_v42 = vld [vmem:[#allocation3 + $0x1a8] sm:$0xff] }
  0x3d   :  { %574 = vmatpush1.msra.mxu1 %v388_v5  ;;  %468 = vmatprep.subr.mxu0 %v323_v6  ;;  %v434_v41 = vld [vmem:[#allocation3 + $0x3b0] sm:$0xff]  ;;  %v433_v43 = vld [vmem:[#allocation3 + $0x3a8] sm:$0xff]  ;;  %v368_v44 = vld [vmem:[#allocation3 + $0x1a0] sm:$0xff] }
  0x3e   :  { %575 = vmatprep.subr.mxu1 %v387_v7  ;;  %469 = vmatpush1.msra.mxu0 %v322_v8  ;;  %v432_v45 = vld [vmem:[#allocation3 + $0x3a0] sm:$0xff]  ;;  %v367_v46 = vld [vmem:[#allocation3 + $0x198] sm:$0xff]  ;;  %v366_v48 = vld [vmem:[#allocation3 + $0x190] sm:$0xff] }
  0x3f   :  { %576 = vmatpush1.msra.mxu1 %v386_v9  ;;  %470 = vmatprep.subr.mxu0 %v321_v10  ;;  %v431_v47 = vld [vmem:[#allocation3 + $0x398] sm:$0xff]  ;;  %v430_v49 = vld [vmem:[#allocation3 + $0x390] sm:$0xff]  ;;  %v365_v50 = vld [vmem:[#allocation3 + $0x188] sm:$0xff] }
  0x40   :  { %577 = vmatprep.subr.mxu1 %v385_v11  ;;  %471 = vmatpush1.msra.mxu0 %v320_v12  ;;  %v429_v51 = vld [vmem:[#allocation3 + $0x388] sm:$0xff]  ;;  %v364_v52 = vld [vmem:[#allocation3 + $0x180] sm:$0xff]  ;;  %v363_v54 = vld [vmem:[#allocation3 + $0x178] sm:$0xff] }
  0x41   :  { %578 = vmatpush1.msra.mxu1 %v384_v13  ;;  %472 = vmatprep.subr.mxu0 %v319_v14  ;;  %v428_v53 = vld [vmem:[#allocation3 + $0x380] sm:$0xff]  ;;  %v427_v55 = vld [vmem:[#allocation3 + $0x378] sm:$0xff]  ;;  %v362_v56 = vld [vmem:[#allocation3 + $0x170] sm:$0xff] }
  0x42   :  { %579 = vmatprep.subr.mxu1 %v383_v15  ;;  %473 = vmatpush1.msra.mxu0 %v318_v16  ;;  %v426_v57 = vld [vmem:[#allocation3 + $0x370] sm:$0xff]  ;;  %v361_v58 = vld [vmem:[#allocation3 + $0x168] sm:$0xff]  ;;  %v360_v60 = vld [vmem:[#allocation3 + $0x160] sm:$0xff] }
  0x43   :  { %580 = vmatpush1.msra.mxu1 %v382_v17  ;;  %474 = vmatprep.subr.mxu0 %v317_v18  ;;  %v425_v59 = vld [vmem:[#allocation3 + $0x368] sm:$0xff]  ;;  %v424_v61 = vld [vmem:[#allocation3 + $0x360] sm:$0xff]  ;;  %v359_v62 = vld [vmem:[#allocation3 + $0x158] sm:$0xff] }
  0x44   :  { %581 = vmatprep.subr.mxu1 %v381_v19  ;;  %475 = vmatpush1.msra.mxu0 %v316_v20  ;;  %v423_v63 = vld [vmem:[#allocation3 + $0x358] sm:$0xff]  ;;  %v358_v0 = vld [vmem:[#allocation3 + $0x150] sm:$0xff]  ;;  %v357_v2 = vld [vmem:[#allocation3 + $0x148] sm:$0xff] }
  0x45   :  { %582 = vmatpush1.msra.mxu1 %v380_v21  ;;  %476 = vmatprep.subr.mxu0 %v379_v22  ;;  %v422_v1 = vld [vmem:[#allocation3 + $0x350] sm:$0xff]  ;;  %v421_v3 = vld [vmem:[#allocation3 + $0x348] sm:$0xff]  ;;  %v356_v4 = vld [vmem:[#allocation3 + $0x140] sm:$0xff] }
  0x46   :  { %583 = vmatprep.subr.mxu1 %v443_v23  ;;  %477 = vmatpush2.msra.mxu0 %v378_v24  ;;  %v420_v5 = vld [vmem:[#allocation3 + $0x340] sm:$0xff]  ;;  %v355_v6 = vld [vmem:[#allocation3 + $0x138] sm:$0xff]  ;;  %v354_v8 = vld [vmem:[#allocation3 + $0x130] sm:$0xff]  ;;  %v52_v24 = vlaneseq }
  0x47   :  { %584 = vmatpush2.msra.mxu1 %v442_v25  ;;  %478 = vmatprep.subr.mxu0 %v377_v26  ;;  %v419_v7 = vld [vmem:[#allocation3 + $0x338] sm:$0xff]  ;;  %v418_v9 = vld [vmem:[#allocation3 + $0x330] sm:$0xff]  ;;  %v353_v10 = vld [vmem:[#allocation3 + $0x128] sm:$0xff] }
  0x48   :  { %585 = vmatprep.subr.mxu1 %v441_v27  ;;  %479 = vmatpush2.msra.mxu0 %v376_v28  ;;  %v417_v11 = vld [vmem:[#allocation3 + $0x328] sm:$0xff]  ;;  %v352_v12 = vld [vmem:[#allocation3 + $0x120] sm:$0xff]  ;;  %v351_v14 = vld [vmem:[#allocation3 + $0x118] sm:$0xff]  ;;  %v1804_v25 = vand.u32 127, %v52_v24 }
  0x49   :  { %586 = vmatpush2.msra.mxu1 %v440_v29  ;;  %480 = vmatprep.subr.mxu0 %v375_v30  ;;  %v416_v13 = vld [vmem:[#allocation3 + $0x320] sm:$0xff]  ;;  %v415_v15 = vld [vmem:[#allocation3 + $0x318] sm:$0xff]  ;;  %v350_v16 = vld [vmem:[#allocation3 + $0x110] sm:$0xff] }
  0x4a   :  { %587 = vmatprep.subr.mxu1 %v439_v31  ;;  %481 = vmatpush2.msra.mxu0 %v374_v32  ;;  %v414_v17 = vld [vmem:[#allocation3 + $0x310] sm:$0xff]  ;;  %v349_v18 = vld [vmem:[#allocation3 + $0x108] sm:$0xff]  ;;  %v348_v20 = vld [vmem:[#allocation3 + $0x100] sm:$0xff]  ;;  %v1807_v26 = vadd.s32 128, %v1804_v25  ;;  %v1810_v27 = vadd.s32 256, %v1804_v25  ;;  %v1813_v28 = vadd.s32 384, %v1804_v25 }
  0x4b   :  { %588 = vmatpush2.msra.mxu1 %v438_v33  ;;  %482 = vmatprep.subr.mxu0 %v373_v34  ;;  %v413_v19 = vld [vmem:[#allocation3 + $0x308] sm:$0xff]  ;;  %v412_v21 = vld [vmem:[#allocation3 + $0x300] sm:$0xff]  ;;  %v1796_v22 = vld [vmem:[#allocation6 + $0x78] sm:$0xff]  ;;  %v1711_v31 = vmov 0.0  }
  0x4c   :  { %589 = vmatprep.subr.mxu1 %v437_v35  ;;  %483 = vmatpush2.msra.mxu0 %v372_v36  ;;  %v1525_v23 = vld [vmem:[%s2359_s5] ss:$0 sm:$0xff] }
  0x4d   :  { %590 = vmatpush2.msra.mxu1 %v436_v37  ;;  %484 = vmatprep.subr.mxu0 %v371_v38 }
  0x4e   :  { %591 = vmatprep.subr.mxu1 %v435_v39  ;;  %485 = vmatpush2.msra.mxu0 %v370_v40 }
  0x4f   :  { %592 = vmatpush2.msra.mxu1 %v434_v41  ;;  %486 = vmatprep.subr.mxu0 %v369_v42 }
  0x50   :  { %593 = vmatprep.subr.mxu1 %v433_v43  ;;  %487 = vmatpush2.msra.mxu0 %v368_v44 }
  0x51   :  { %594 = vmatpush2.msra.mxu1 %v432_v45  ;;  %488 = vmatprep.subr.mxu0 %v367_v46 }
  0x52   :  { %595 = vmatprep.subr.mxu1 %v431_v47  ;;  %489 = vmatpush2.msra.mxu0 %v366_v48 }
  0x53   :  { %596 = vmatpush2.msra.mxu1 %v430_v49  ;;  %490 = vmatprep.subr.mxu0 %v365_v50 }
  0x54   :  { %597 = vmatprep.subr.mxu1 %v429_v51  ;;  %491 = vmatpush2.msra.mxu0 %v364_v52  ;;  %v1857_v52 = vld [vmem:[#allocation6 + $0x70] sm:$0xff] }
  0x55   :  { %598 = vmatpush2.msra.mxu1 %v428_v53  ;;  %492 = vmatprep.subr.mxu0 %v363_v54  ;;  %v1867_v53 = vld [vmem:[#allocation6 + $0x68] sm:$0xff] }
  0x56   :  { %599 = vmatprep.subr.mxu1 %v427_v55  ;;  %493 = vmatpush2.msra.mxu0 %v362_v56 }
  0x57   :  { %600 = vmatpush2.msra.mxu1 %v426_v57  ;;  %494 = vmatprep.subr.mxu0 %v361_v58 }
  0x58   :  { %601 = vmatprep.subr.mxu1 %v425_v59  ;;  %495 = vmatpush2.msra.mxu0 %v360_v60 }
  0x59   :  { %602 = vmatpush2.msra.mxu1 %v424_v61  ;;  %496 = vmatprep.subr.mxu0 %v359_v62 }
  0x5a   :  { %603 = vmatprep.subr.mxu1 %v423_v63  ;;  %497 = vmatpush2.msra.mxu0 %v358_v0  ;;  %v1899_v0 = vld [vmem:[#allocation6 + $0x60] sm:$0xff] }
  0x5b   :  { %604 = vmatpush2.msra.mxu1 %v422_v1  ;;  %498 = vmatprep.subr.mxu0 %v357_v2 }
  0x5c   :  { %605 = vmatprep.subr.mxu1 %v421_v3  ;;  %499 = vmatpush2.msra.mxu0 %v356_v4 }
  0x5d   :  { %606 = vmatpush2.msra.mxu1 %v420_v5  ;;  %500 = vmatprep.subr.mxu0 %v355_v6  ;;  %v1917_v5 = vld [vmem:[#allocation6 + $0x58] sm:$0xff] }
  0x5e   :  { %607 = vmatprep.subr.mxu1 %v419_v7  ;;  %501 = vmatpush2.msra.mxu0 %v354_v8 }
  0x5f   :  { %608 = vmatpush2.msra.mxu1 %v418_v9  ;;  %502 = vmatprep.subr.mxu0 %v353_v10  ;;  %v1931_v9 = vld [vmem:[#allocation6 + $0x50] sm:$0xff] }
  0x60   :  { %609 = vmatprep.subr.mxu1 %v417_v11  ;;  %503 = vmatpush2.msra.mxu0 %v352_v12 }
  0x61   :  { %610 = vmatpush2.msra.mxu1 %v416_v13  ;;  %504 = vmatprep.subr.mxu0 %v351_v14 }
  0x62   :  { %611 = vmatprep.subr.mxu1 %v415_v15  ;;  %505 = vmatpush2.msra.mxu0 %v350_v16  ;;  %v1952_v15 = vld [vmem:[#allocation6 + $0x48] sm:$0xff] }
  0x63   :  { %612 = vmatpush2.msra.mxu1 %v414_v17  ;;  %506 = vmatprep.subr.mxu0 %v349_v18 }
  0x64   :  { %613 = vmatprep.subr.mxu1 %v413_v19  ;;  %507 = vmatpush2.msra.mxu0 %v348_v20 }
  0x65   :  { %614 = vmatpush2.msra.mxu1 %v412_v21  ;;  %727 = vmatprep.subr.mxu0 %v1796_v22 }
  0x66   :  { %800 = vrot.lane.b32.xlu0 %v1525_v23, %s1710_s10  ;;  %836 = vmatprep.subr.mxu1 %v1796_v22 }
  0x99   :  { %v69_v29 = vpop.permute.xlu1 %68  ;;  %v66_v30 = vpop.permute.xlu0 %65 }
  0x9a   :  { %vm89_vm0 = vcmp.eq.s32.totalorder %v69_v29, %v1804_v25  ;;  %vm90_vm1 = vcmp.eq.s32.totalorder %v69_v29, %v1807_v26  ;;  %vm91_vm2 = vcmp.eq.s32.totalorder %v69_v29, %v1810_v27  ;;  %vm92_vm3 = vcmp.eq.s32.totalorder %v69_v29, %v1813_v28 }
  0x9b   :  { %vm85_vm4 = vcmp.eq.s32.totalorder %v66_v30, %v1804_v25  ;;  %vm87_vm5 = vcmp.eq.s32.totalorder %v66_v30, %v1810_v27  ;;  %vm86_vm6 = vcmp.eq.s32.totalorder %v66_v30, %v1807_v26  ;;  %vm88_vm7 = vcmp.eq.s32.totalorder %v66_v30, %v1813_v28 }
  0x9c   :  { %v1469_v32 = vsel %vm86_vm6, 1.0, %v1711_v31  ;;  %v1471_v33 = vsel %vm88_vm7, 1.0, %v1711_v31  ;;  %v1468_v34 = vsel %vm85_vm4, 1.0, %v1711_v31  ;;  %v1470_v37 = vsel %vm87_vm5, 1.0, %v1711_v31 }
  0x9d   :  { %v188_v35 = vpop.permute.xlu1 %187  ;;  %v185_v36 = vpop.permute.xlu0 %184  ;;  %v1473_v38 = vsel %vm90_vm1, 1.0, %v1711_v31  ;;  %v1475_v39 = vsel %vm92_vm3, 1.0, %v1711_v31  ;;  %v1472_v40 = vsel %vm89_vm0, 1.0, %v1711_v31  ;;  %v1474_v41 = vsel %vm91_vm2, 1.0, %v1711_v31 }
  0x9e   :  { %vm208_vm8 = vcmp.eq.s32.totalorder %v188_v35, %v1804_v25  ;;  %vm209_vm9 = vcmp.eq.s32.totalorder %v188_v35, %v1807_v26  ;;  %vm211_vm10 = vcmp.eq.s32.totalorder %v188_v35, %v1813_v28  ;;  %vm204_vm11 = vcmp.eq.s32.totalorder %v185_v36, %v1804_v25 }
  0x9f   :  { %vm206_vm12 = vcmp.eq.s32.totalorder %v185_v36, %v1810_v27  ;;  %vm205_vm13 = vcmp.eq.s32.totalorder %v185_v36, %v1807_v26  ;;  %vm207_vm14 = vcmp.eq.s32.totalorder %v185_v36, %v1813_v28  ;;  %v1496_v44 = vsel %vm204_vm11, 1.0, %v1711_v31 }
  0xa0   :  { %v1497_v42 = vsel %vm205_vm13, 1.0, %v1711_v31  ;;  %v1499_v43 = vsel %vm207_vm14, 1.0, %v1711_v31  ;;  %v1498_v45 = vsel %vm206_vm12, 1.0, %v1711_v31  ;;  %v288_v50 = vadd.f32 %v1496_v44, %v1468_v34 }
  0xa1   :  { %v1846_v46 = vpop.permute.xlu1 %190  ;;  %v1848_v47 = vpop.permute.xlu0 %71  ;;  %v289_v48 = vadd.f32 %v1497_v42, %v1469_v32  ;;  %v291_v49 = vadd.f32 %v1499_v43, %v1471_v33  ;;  %v290_v51 = vadd.f32 %v1498_v45, %v1470_v37  ;;  %vm210_vm15 = vcmp.eq.s32.totalorder %v188_v35, %v1810_v27  ;;  %v1994_v32 = vld [vmem:[#allocation6 + $0x40] sm:$0xff]  ;;  %v2004_v33 = vld [vmem:[#allocation6 + $0x38] sm:$0xff] }
  0xa2   :  { %vm212_vm0 = vcmp.eq.s32.totalorder %v1846_v46, %v1804_v25  ;;  %vm213_vm1 = vcmp.eq.s32.totalorder %v1846_v46, %v1807_v26  ;;  %vm214_vm2 = vcmp.eq.s32.totalorder %v1846_v46, %v1810_v27  ;;  %vm215_vm3 = vcmp.eq.s32.totalorder %v1846_v46, %v1813_v28 }
  0xa3   :  { %vm93_vm4 = vcmp.eq.s32.totalorder %v1848_v47, %v1804_v25  ;;  %vm94_vm5 = vcmp.eq.s32.totalorder %v1848_v47, %v1807_v26  ;;  %vm95_vm6 = vcmp.eq.s32.totalorder %v1848_v47, %v1810_v27  ;;  %508 = vmatprep.mubr.f32.mxu0 %v289_v48  ;;  %vm96_vm7 = vcmp.eq.s32.totalorder %v1848_v47, %v1813_v28 }
  0xa4   :  { %615 = vmatprep.mubr.f32.mxu1 %v291_v49  ;;  %509 = vmatmul.mubr.f32.vlgmr.msra.gmra.mxu0 %v288_v50  ;;  %v1501_v54 = vsel %vm209_vm9, 1.0, %v1711_v31  ;;  %v1503_v55 = vsel %vm211_vm10, 1.0, %v1711_v31  ;;  %v1500_v56 = vsel %vm208_vm8, 1.0, %v1711_v31  ;;  %v1502_v61 = vsel %vm210_vm15, 1.0, %v1711_v31  ;;  %v2056_v49 = vld [vmem:[#allocation6 + $0x28] sm:$0xff] }
  0xa5   :  { %616 = vmatmul.mubr.f32.vlgmr.msra.gmra.mxu1 %v290_v51  ;;  %728 = vmatpush1.msra.mxu0 %v1857_v52  ;;  %v293_v57 = vadd.f32 %v1501_v54, %v1473_v38  ;;  %v295_v58 = vadd.f32 %v1503_v55, %v1475_v39  ;;  %v1881_v59 = vpop.permute.xlu1 %193  ;;  %v1883_v60 = vpop.permute.xlu0 %74  ;;  %v1477_v62 = vsel %vm94_vm5, 1.0, %v1711_v31  ;;  %v292_v63 = vadd.f32 %v1500_v56, %v1472_v40  ;;  %v2069_v51 = vld [vmem:[#allocation6 + $0x20] sm:$0xff]  ;;  %v2081_v55 = vld [vmem:[#allocation6 + $0x18] sm:$0xff] }
  0xa6   :  { %vm216_vm8 = vcmp.eq.s32.totalorder %v1881_v59, %v1804_v25  ;;  %vm217_vm9 = vcmp.eq.s32.totalorder %v1881_v59, %v1807_v26  ;;  %vm218_vm10 = vcmp.eq.s32.totalorder %v1881_v59, %v1810_v27  ;;  %729 = vmatprep.subr.mxu0 %v1867_v53  ;;  %vm219_vm11 = vcmp.eq.s32.totalorder %v1881_v59, %v1813_v28 }
  0xa7   :  { %514 = vmatprep.mubr.f32.mxu0 %v293_v57  ;;  %621 = vmatprep.mubr.f32.mxu1 %v295_v58  ;;  %vm97_vm12 = vcmp.eq.s32.totalorder %v1883_v60, %v1804_v25  ;;  %vm98_vm13 = vcmp.eq.s32.totalorder %v1883_v60, %v1807_v26  ;;  %v1505_v1 = vsel %vm213_vm1, 1.0, %v1711_v31  ;;  %vm99_vm14 = vcmp.eq.s32.totalorder %v1883_v60, %v1810_v27 }
  0xa8   :  { %515 = vmatmul.mubr.f32.gmra.mxu0 %v292_v63  ;;  %v294_v2 = vadd.f32 %v1502_v61, %v1474_v41  ;;  %v297_v3 = vadd.f32 %v1505_v1, %v1477_v62  ;;  %v1479_v4 = vsel %vm96_vm7, 1.0, %v1711_v31  ;;  %837 = vmatpush1.msra.mxu1 %v1857_v52  ;;  %vm100_vm15 = vcmp.eq.s32.totalorder %v1883_v60, %v1813_v28  ;;  %v2033_v41 = vld [vmem:[#allocation6 + $0x30] sm:$0xff] }
  0xa9   :  { %730 = vmatpush1.msra.mxu0 %v1899_v0  ;;  %v1507_v6 = vsel %vm215_vm3, 1.0, %v1711_v31  ;;  %v1927_v7 = vpop.permute.xlu1 %196  ;;  %v1929_v8 = vpop.permute.xlu0 %77  ;;  %v1476_v10 = vsel %vm93_vm4, 1.0, %v1711_v31  ;;  %v1504_v11 = vsel %vm212_vm0, 1.0, %v1711_v31  ;;  %838 = vmatprep.subr.mxu1 %v1867_v53  ;;  %v1478_v13 = vsel %vm95_vm6, 1.0, %v1711_v31  ;;  %v2096_v60 = vld [vmem:[#allocation6 + $0x10] sm:$0xff] }
  0xaa   :  { %622 = vmatmul.mubr.f32.gmra.mxu1 %v294_v2  ;;  %520 = vmatprep.mubr.f32.mxu0 %v297_v3  ;;  %v299_v12 = vadd.f32 %v1507_v6, %v1479_v4  ;;  %vm220_vm1 = vcmp.eq.s32.totalorder %v1927_v7, %v1804_v25  ;;  %v1506_v14 = vsel %vm214_vm2, 1.0, %v1711_v31  ;;  %vm221_vm0 = vcmp.eq.s32.totalorder %v1927_v7, %v1807_v26 }
  0xab   :  { %vm223_vm4 = vcmp.eq.s32.totalorder %v1927_v7, %v1813_v28  ;;  %731 = vmatprep.subr.mxu0 %v1917_v5  ;;  %vm101_vm5 = vcmp.eq.s32.totalorder %v1929_v8, %v1804_v25  ;;  %vm102_vm2 = vcmp.eq.s32.totalorder %v1929_v8, %v1807_v26  ;;  %v296_v16 = vadd.f32 %v1504_v11, %v1476_v10 }
  0xac   :  { %627 = vmatprep.mubr.f32.mxu1 %v299_v12  ;;  %732 = vmatpush1.msra.mxu0 %v1931_v9  ;;  %v1481_v17 = vsel %vm98_vm13, 1.0, %v1711_v31  ;;  %v298_v18 = vadd.f32 %v1506_v14, %v1478_v13  ;;  %v1509_v19 = vsel %vm217_vm9, 1.0, %v1711_v31  ;;  %v1483_v20 = vsel %vm100_vm15, 1.0, %v1711_v31 }
  0xad   :  { %v1511_v21 = vsel %vm219_vm11, 1.0, %v1711_v31  ;;  %v1984_v23 = vpop.permute.xlu1 %199  ;;  %733 = vmatprep.subr.mxu0 %v1952_v15  ;;  %v1987_v24 = vpop.permute.xlu0 %80  ;;  %839 = vmatpush1.msra.mxu1 %v1899_v0  ;;  %vm104_vm7 = vcmp.eq.s32.totalorder %v1929_v8, %v1813_v28  ;;  %v301_v29 = vadd.f32 %v1509_v19, %v1481_v17  ;;  %v1480_v34 = vsel %vm97_vm12, 1.0, %v1711_v31 }
  0xae   :  { %521 = vmatmul.mubr.f32.gmra.mxu0 %v296_v16  ;;  %v303_v30 = vadd.f32 %v1511_v21, %v1483_v20  ;;  %628 = vmatmul.mubr.f32.gmra.mxu1 %v298_v18  ;;  %vm225_vm11 = vcmp.eq.s32.totalorder %v1984_v23, %v1807_v26  ;;  %vm226_vm13 = vcmp.eq.s32.totalorder %v1984_v23, %v1810_v27  ;;  %v1508_v35 = vsel %vm216_vm8, 1.0, %v1711_v31  ;;  %v2160_v21 = vld [vmem:[#allocation6] sm:$0xff] }
  0xaf   :  { %vm227_vm15 = vcmp.eq.s32.totalorder %v1984_v23, %v1813_v28  ;;  %vm105_vm3 = vcmp.eq.s32.totalorder %v1987_v24, %v1804_v25  ;;  %526 = vmatprep.mubr.f32.mxu0 %v301_v29  ;;  %vm106_vm9 = vcmp.eq.s32.totalorder %v1987_v24, %v1807_v26  ;;  %vm107_vm6 = vcmp.eq.s32.totalorder %v1987_v24, %v1810_v27 }
  0xb0   :  { %633 = vmatprep.mubr.f32.mxu1 %v303_v30  ;;  %734 = vmatpush1.msra.mxu0 %v1994_v32  ;;  %v300_v36 = vadd.f32 %v1508_v35, %v1480_v34  ;;  %v1482_v37 = vsel %vm99_vm14, 1.0, %v1711_v31  ;;  %v1510_v38 = vsel %vm218_vm10, 1.0, %v1711_v31  ;;  %v1485_v39 = vsel %vm102_vm2, 1.0, %v1711_v31 }
  0xb1   :  { %v2031_v40 = vpop.permute.xlu1 %202  ;;  %840 = vmatprep.subr.mxu1 %v1917_v5  ;;  %v302_v42 = vadd.f32 %v1510_v38, %v1482_v37  ;;  %v1513_v43 = vsel %vm221_vm0, 1.0, %v1711_v31  ;;  %v1487_v44 = vsel %vm104_vm7, 1.0, %v1711_v31  ;;  %v1515_v45 = vsel %vm223_vm4, 1.0, %v1711_v31  ;;  %735 = vmatprep.subr.mxu0 %v2004_v33  ;;  %v2049_v46 = vpop.permute.xlu0 %83 }
  0xb2   :  { %841 = vmatpush1.msra.mxu1 %v1931_v9  ;;  %vm108_vm8 = vcmp.eq.s32.totalorder %v1987_v24, %v1813_v28  ;;  %527 = vmatmul.mubr.f32.gmra.mxu0 %v300_v36  ;;  %v305_v47 = vadd.f32 %v1513_v43, %v1485_v39  ;;  %v307_v48 = vadd.f32 %v1515_v45, %v1487_v44  ;;  %v1484_v50 = vsel %vm101_vm5, 1.0, %v1711_v31 }
  0xb3   :  { %vm228_vm10 = vcmp.eq.s32.totalorder %v2031_v40, %v1804_v25  ;;  %634 = vmatmul.mubr.f32.gmra.mxu1 %v302_v42  ;;  %vm229_vm12 = vcmp.eq.s32.totalorder %v2031_v40, %v1807_v26  ;;  %vm231_vm0 = vcmp.eq.s32.totalorder %v2031_v40, %v1813_v28  ;;  %736 = vmatpush1.msra.mxu0 %v2033_v41  ;;  %v1512_v54 = vsel %vm220_vm1, 1.0, %v1711_v31 }
  0xb4   :  { %532 = vmatprep.mubr.f32.mxu0 %v305_v47  ;;  %639 = vmatprep.mubr.f32.mxu1 %v307_v48  ;;  %vm109_vm4 = vcmp.eq.s32.totalorder %v2049_v46, %v1804_v25  ;;  %vm110_vm2 = vcmp.eq.s32.totalorder %v2049_v46, %v1807_v26  ;;  %vm112_vm7 = vcmp.eq.s32.totalorder %v2049_v46, %v1813_v28  ;;  %v1489_v59 = vsel %vm106_vm9, 1.0, %v1711_v31 }
  0xb5   :  { %v304_v56 = vadd.f32 %v1512_v54, %v1484_v50  ;;  %vm2361_vm5 = vcmp.eq.s32.totalorder %v1929_v8, %v1810_v27  ;;  %vm2362_vm14 = vcmp.eq.s32.totalorder %v1927_v7, %v1810_v27  ;;  %737 = vmatprep.subr.mxu0 %v2056_v49  ;;  %842 = vmatprep.subr.mxu1 %v1952_v15  ;;  %v1517_v62 = vsel %vm225_vm11, 1.0, %v1711_v31  ;;  %v2122_v7 = vld [vmem:[#allocation6 + $0x8] sm:$0xff] }
  0xb6   :  { %v1486_v57 = vsel %vm2361_vm5, 1.0, %v1711_v31  ;;  %v1514_v58 = vsel %vm2362_vm14, 1.0, %v1711_v31  ;;  %v1491_v63 = vsel %vm108_vm8, 1.0, %v1711_v31  ;;  %v1519_v1 = vsel %vm227_vm15, 1.0, %v1711_v31  ;;  %738 = vmatpush1.msra.mxu0 %v2069_v51  ;;  %843 = vmatpush1.msra.mxu1 %v1994_v32 }
  0xb7   :  { %v306_v61 = vadd.f32 %v1514_v58, %v1486_v57  ;;  %533 = vmatmul.mubr.f32.gmra.mxu0 %v304_v56  ;;  %v309_v2 = vadd.f32 %v1517_v62, %v1489_v59  ;;  %v311_v3 = vadd.f32 %v1519_v1, %v1491_v63  ;;  %v1488_v4 = vsel %vm105_vm3, 1.0, %v1711_v31  ;;  %739 = vmatprep.subr.mxu0 %v2081_v55 }
  0xb8   :  { %vm2363_vm1 = vcmp.eq.s32.totalorder %v1984_v23, %v1804_v25  ;;  %vm111_vm9 = vcmp.eq.s32.totalorder %v2049_v46, %v1810_v27  ;;  %v1490_v8 = vsel %vm107_vm6, 1.0, %v1711_v31  ;;  %v1518_v10 = vsel %vm226_vm13, 1.0, %v1711_v31  ;;  %740 = vmatpush1.msra.mxu0 %v2096_v60  ;;  %844 = vmatprep.subr.mxu1 %v2004_v33 }
  0xb9   :  { %v1516_v6 = vsel %vm2363_vm1, 1.0, %v1711_v31  ;;  %640 = vmatmul.mubr.f32.gmra.mxu1 %v306_v61  ;;  %v1493_v11 = vsel %vm110_vm2, 1.0, %v1711_v31  ;;  %538 = vmatprep.mubr.f32.mxu0 %v309_v2  ;;  %v1521_v13 = vsel %vm229_vm12, 1.0, %v1711_v31  ;;  %v1495_v14 = vsel %vm112_vm7, 1.0, %v1711_v31 }
  0xba   :  { %645 = vmatprep.mubr.f32.mxu1 %v311_v3  ;;  %v308_v12 = vadd.f32 %v1516_v6, %v1488_v4  ;;  %v1523_v16 = vsel %vm231_vm0, 1.0, %v1711_v31  ;;  %v310_v17 = vadd.f32 %v1518_v10, %v1490_v8  ;;  %v313_v18 = vadd.f32 %v1521_v13, %v1493_v11  ;;  %741 = vmatprep.subr.mxu0 %v2122_v7 }
  0xbb   :  { %v1492_v19 = vsel %vm109_vm4, 1.0, %v1711_v31  ;;  %v1520_v20 = vsel %vm228_vm10, 1.0, %v1711_v31  ;;  %v315_v28 = vadd.f32 %v1523_v16, %v1495_v14  ;;  %v1494_v23 = vsel %vm111_vm9, 1.0, %v1711_v31  ;;  %845 = vmatpush1.msra.mxu1 %v2033_v41  ;;  %742 = vmatpush1.msra.mxu0 %v2160_v21 }
  0xbc   :  { %539 = vmatmul.mubr.f32.gmra.mxu0 %v308_v12  ;;  %vm2364_vm3 = vcmp.eq.s32.totalorder %v2031_v40, %v1810_v27  ;;  %v312_v25 = vadd.f32 %v1520_v20, %v1492_v19  ;;  %846 = vmatprep.subr.mxu1 %v2056_v49  ;;  %v1524_v27 = vld [vmem:[%s2358_s4] ss:$0 sm:$0xff]  ;;  %vm708_vm6 = vcmask 523264   ;;  %vm675_vm11 = vcmp.lt.s32.totalorder %v1807_v26, 192  ;;  %s1712_s4 = smov [#allocation8]  }
  0xbd   :  { %v1522_v24 = vsel %vm2364_vm3, 1.0, %v1711_v31  ;;  %646 = vmatmul.mubr.f32.gmra.mxu1 %v310_v17  ;;  %544 = vmatprep.mubr.f32.mxu0 %v313_v18  ;;  %s1458_s12 = sshll.u32 %s1712_s4, 4  ;;  %s1459_s12 = int_to_ptr.vmem [resolvable:$true] %s1458_s12 }
  0xbe   :  { %651 = vmatprep.mubr.f32.mxu1 %v315_v28  ;;  %v314_v29 = vadd.f32 %v1522_v24, %v1494_v23  ;;  %942 = vmatprep.subr.mxu0 %v1796_v22  ;;  %s1679_s13 = scalar_lea.vmem %s1459_s12, 128  ;;  %p1684_p11 = scmp.lt.s32.totalorder %s1459_s12, %s1459_s12 }
  0xbf   :  { %847 = vmatpush1.msra.mxu1 %v2069_v51  ;;  %p1680_p10 = scmp.ne.s32.totalorder %s1459_s12, %s1679_s13  ;;  %p1685_p12 = scmp.lt.s32.totalorder %s1679_s13, %s1679_s13 }
  0xc0   :  { %545 = vmatmul.mubr.f32.gmra.mxu0 %v312_v25  ;;  %848 = vmatprep.subr.mxu1 %v2081_v55 }
  0xc1   :  { %652 = vmatmul.mubr.f32.gmra.mxu1 %v314_v29  ;;  %775 = vmatprep.mubr.f32.mxu0 %v1711_v31  ;;  %p1686_p13 = por %p1685_p12, %p1684_p11 }
  0xc2   :  { %884 = vmatprep.mubr.f32.mxu1 %v1711_v31  ;;  %849 = vmatpush1.msra.mxu1 %v2096_v60 }
  0xc3   :  { %850 = vmatprep.subr.mxu1 %v2122_v7  ;;  %p1687_p0 = pnand %p1686_p13, %p1680_p10 }
  0xc4   :  { %1526 = vmatmul.mubr.msk.f32.vlgmr.msra.gmra.mxu0 %vm708_vm6, %v1524_v27  ;;  %851 = vmatpush1.msra.mxu1 %v2160_v21 }
  0xc5   :  { %943 = vmatpush1.msra.mxu0 %v1857_v52  ;;  %990 = vmatprep.mubr.f32.mxu0 %v1711_v31 }
  0xc6   :  { %944 = vmatprep.subr.mxu0 %v1867_v53  ;;  %1048 = vmatprep.subr.mxu1 %v1796_v22 }
  0xc7   :  { %945 = vmatpush1.msra.mxu0 %v1899_v0 }
  0xc8   :  { %946 = vmatprep.subr.mxu0 %v1917_v5 }
  0xc9   :  { %947 = vmatpush1.msra.mxu0 %v1931_v9 }
  0xca   :  { %948 = vmatprep.subr.mxu0 %v1952_v15 }
  0xcb   :  { %949 = vmatpush1.msra.mxu0 %v1994_v32 }
  0xcc   :  { %950 = vmatprep.subr.mxu0 %v2004_v33 }
  0xcd   :  { %951 = vmatpush1.msra.mxu0 %v2033_v41 }
  0xce   :  { %952 = vmatprep.subr.mxu0 %v2056_v49 }
  0xcf   :  { %953 = vmatpush1.msra.mxu0 %v2069_v51 }
  0xd0   :  { %954 = vmatprep.subr.mxu0 %v2081_v55 }
  0xd1   :  { %955 = vmatpush1.msra.mxu0 %v2096_v60 }
  0xd2   :  { %956 = vmatprep.subr.mxu0 %v2122_v7 }
  0xd3   :  { %957 = vmatpush1.msra.mxu0 %v2160_v21 }
  0xd4   :  { %1154 = vmatprep.subr.mxu0 %v1796_v22 }
 0x164   :  { %v510_v30 = vpop.f32.mrf.mxu0 }
 0x165   :  { %v617_v34 = vpop.f32.mrf.mxu1 }
 0x166   :  { %v512_v35 = vpop.f32.mrf.mxu0  ;;  %v618_v17 = vadd.f32 %v617_v34, %v510_v30 }
 0x167   :  { %v619_v36 = vpop.f32.mrf.mxu1 }
 0x168   :  { %v2204_v37 = vpop.f32.mrf.mxu0  ;;  %v620_v19 = vadd.f32 %v619_v36, %v512_v35 }
 0x16a   :  { %v2206_v38 = vpop.f32.mrf.mxu1  ;;  %v2208_v39 = vpop.f32.mrf.mxu0 }
 0x16c   :  { %v2210_v40 = vpop.f32.mrf.mxu1 }
 0x16e   :  { %v522_v42 = vpop.f32.mrf.mxu0  ;;  %v629_v43 = vpop.f32.mrf.mxu1 }
 0x16f   :  { %v2212_v44 = vadd.f32 %v629_v43, %v522_v42 }
 0x170   :  { %v524_v45 = vpop.f32.mrf.mxu0  ;;  %v631_v46 = vpop.f32.mrf.mxu1 }
 0x171   :  { %v2214_v47 = vadd.f32 %v631_v46, %v524_v45  ;;  %v801_v46 = vpop.permute.xlu0 %800 }
 0x172   :  { %v528_v48 = vpop.f32.mrf.mxu0 }
 0x173   :  { %v635_v50 = vpop.f32.mrf.mxu1 }
 0x174   :  { %v2216_v54 = vadd.f32 %v635_v50, %v528_v48  ;;  %v530_v56 = vpop.f32.mrf.mxu0 }
 0x175   :  { %v637_v57 = vpop.f32.mrf.mxu1 }
 0x176   :  { %v2218_v58 = vadd.f32 %v637_v57, %v530_v56 }
 0x177   :  { %v534_v59 = vpop.f32.mrf.mxu0 }
 0x179   :  { %v641_v61 = vpop.f32.mrf.mxu1  ;;  %v536_v63 = vpop.f32.mrf.mxu0 }
 0x17a   :  { %v2220_v62 = vadd.f32 %v641_v61, %v534_v59 }
 0x17b   :  { %v643_v1 = vpop.f32.mrf.mxu1 }
 0x17c   :  { %v2222_v2 = vadd.f32 %v643_v1, %v536_v63  ;;  %v540_v3 = vpop.f32.mrf.mxu0  ;;  %v624_v1 = vadd.f32 %v2206_v38, %v2204_v37 }
 0x17d   :  { %v647_v4 = vpop.f32.mrf.mxu1 }
 0x17e   :  { %v2224_v6 = vadd.f32 %v647_v4, %v540_v3  ;;  %v542_v8 = vpop.f32.mrf.mxu0  ;;  %v626_v4 = vadd.f32 %v2210_v40, %v2208_v39 }
 0x17f   :  { %v649_v10 = vpop.f32.mrf.mxu1 }
 0x180   :  { %v2226_v11 = vadd.f32 %v649_v10, %v542_v8  ;;  %v546_v12 = vpop.f32.mrf.mxu0 }
 0x181   :  { %v653_v13 = vpop.f32.mrf.mxu1 }
 0x182   :  { %v2228_v14 = vadd.f32 %v653_v13, %v546_v12  ;;  %v2230_v16 = vpop.f32.mrf.mxu0 }
 0x183   :  { %v2255_v63 = vpop.f32.mrf.mxu1 }
 0x184   :  { %v777_v18 = vpop.f32.mrf.mxu0 }
 0x185   :  { %v782_v20 = vadd.f32 %v777_v18, %v618_v17 }
 0x186   :  { %v779_v28 = vpop.f32.mrf.mxu0 }
 0x187   :  { %v1527_v23 = vmul.f32 -1.442695, %v782_v20  ;;  %v783_v24 = vadd.f32 %v779_v28, %v620_v19 }
 0x189   :  { %1557 = vpow2.f32 %v1527_v23  ;;  %v1528_v25 = vmul.f32 -1.442695, %v783_v24 }
 0x18b   :  { %1559 = vpow2.f32 %v1528_v25 }
 0x18c   :  { %1561 = vtanh.f32 %v783_v24 }
 0x196   :  { %v1558_v29 = vpop.eup %1557 }
 0x197   :  { %v792_v42 = vadd.f32 1.0, %v1558_v29 }
 0x198   :  { %v1560_v27 = vpop.eup %1559 }
 0x199   :  { %v793_v43 = vadd.f32 1.0, %v1560_v27  ;;  %v1562_v45 = vpop.eup %1561 }
 0x19b   :  { %1563 = vrcp.f32 %v793_v43 }
 0x19c   :  { %1565 = vrcp.f32 %v792_v42 }
 0x1a8   :  { %v1564_v30 = vpop.eup %1563 }
 0x1a9   :  { %v1566_v34 = vpop.eup %1565  ;;  %v799_v35 = vsel %vm675_vm11, %v1562_v45, %v1564_v30 }
 0x1aa   :  { %v804_v36 = vmul.f32 %v1566_v34, %v799_v35  ;;  %v803_v48 = vmul.f32 %v1566_v34, %v801_v46 }
 0x1ac   :  { %806 = vrot.lane.b32.xlu1 %v804_v36, %s1710_s10 }
 0x21e   :  { %v807_v50 = vpop.permute.xlu1 %806 }
 0x21f   :  { %v809_v56 = vadd.f32 %v807_v50, %v803_v48 }
 0x221   :  { %1567 = vtanh.f32 %v809_v56 }
 0x22e   :  { %v1568_v57 = vpop.eup %1567 }
 0x22f   :  { %v811_v59 = vmul.f32 %v1568_v57, %v799_v35 }
 0x231   :  { %816 = vrot.lane.b32.xlu0 %v811_v59, %s1710_s10 }
 0x2a3   :  { %v817_v61 = vpop.permute.xlu0 %816 }
 0x2a4   :  { %1529 = vmatmul.mubr.msk.f32.vlgmr.msra.gmra.mxu1 %vm708_vm6, %v817_v61 }
 0x2a5   :  { %1049 = vmatpush1.msra.mxu1 %v1857_v52  ;;  %1096 = vmatprep.mubr.f32.mxu1 %v1711_v31 }
 0x2a6   :  { %1050 = vmatprep.subr.mxu1 %v1867_v53 }
 0x2a7   :  { %1051 = vmatpush1.msra.mxu1 %v1899_v0 }
 0x2a8   :  { %1052 = vmatprep.subr.mxu1 %v1917_v5 }
 0x2a9   :  { %1053 = vmatpush1.msra.mxu1 %v1931_v9 }
 0x2aa   :  { %1054 = vmatprep.subr.mxu1 %v1952_v15 }
 0x2ab   :  { %1055 = vmatpush1.msra.mxu1 %v1994_v32 }
 0x2ac   :  { %1056 = vmatprep.subr.mxu1 %v2004_v33 }
 0x2ad   :  { %1057 = vmatpush1.msra.mxu1 %v2033_v41 }
 0x2ae   :  { %1058 = vmatprep.subr.mxu1 %v2056_v49 }
 0x2af   :  { %1059 = vmatpush1.msra.mxu1 %v2069_v51 }
 0x2b0   :  { %1060 = vmatprep.subr.mxu1 %v2081_v55 }
 0x2b1   :  { %1061 = vmatpush1.msra.mxu1 %v2096_v60 }
 0x2b2   :  { %1062 = vmatprep.subr.mxu1 %v2122_v7 }
 0x2b3   :  { %1063 = vmatpush1.msra.mxu1 %v2160_v21 }
 0x2b4   :  { %1260 = vmatprep.subr.mxu1 %v1796_v22 }
 0x364   :  { %v886_v3 = vpop.f32.mrf.mxu1 }
 0x365   :  { %v891_v8 = vadd.f32 %v886_v3, %v624_v1 }
 0x366   :  { %v888_v10 = vpop.f32.mrf.mxu1 }
 0x367   :  { %v1530_v12 = vmul.f32 -1.442695, %v891_v8  ;;  %v892_v13 = vadd.f32 %v888_v10, %v626_v4 }
 0x369   :  { %1569 = vpow2.f32 %v1530_v12  ;;  %v1531_v17 = vmul.f32 -1.442695, %v892_v13 }
 0x36b   :  { %1571 = vpow2.f32 %v1531_v17 }
 0x36c   :  { %1573 = vtanh.f32 %v892_v13 }
 0x376   :  { %v1570_v18 = vpop.eup %1569 }
 0x377   :  { %v901_v20 = vadd.f32 1.0, %v1570_v18 }
 0x378   :  { %v1572_v19 = vpop.eup %1571 }
 0x379   :  { %v902_v28 = vadd.f32 1.0, %v1572_v19  ;;  %v1574_v23 = vpop.eup %1573 }
 0x37b   :  { %1575 = vrcp.f32 %v902_v28 }
 0x37c   :  { %1577 = vrcp.f32 %v901_v20 }
 0x388   :  { %v1576_v37 = vpop.eup %1575 }
 0x389   :  { %v1578_v38 = vpop.eup %1577  ;;  %v908_v39 = vsel %vm675_vm11, %v1574_v23, %v1576_v37 }
 0x38a   :  { %v910_v40 = vmul.f32 %v1578_v38, %v908_v39  ;;  %v909_v24 = vmul.f32 %v1578_v38, %v809_v56 }
 0x38c   :  { %912 = vrot.lane.b32.xlu1 %v910_v40, %s1710_s10 }
 0x3fe   :  { %v913_v25 = vpop.permute.xlu1 %912 }
 0x3ff   :  { %v915_v29 = vadd.f32 %v913_v25, %v909_v24 }
 0x401   :  { %1579 = vtanh.f32 %v915_v29 }
 0x40e   :  { %v1580_v27 = vpop.eup %1579 }
 0x40f   :  { %v917_v42 = vmul.f32 %v1580_v27, %v908_v39 }
 0x411   :  { %922 = vrot.lane.b32.xlu0 %v917_v42, %s1710_s10 }
 0x483   :  { %v923_v43 = vpop.permute.xlu0 %922 }
 0x484   :  { %1532 = vmatmul.mubr.msk.f32.vlgmr.msra.gmra.mxu0 %vm708_vm6, %v923_v43 }
 0x485   :  { %1155 = vmatpush1.msra.mxu0 %v1857_v52  ;;  %1202 = vmatprep.mubr.f32.mxu0 %v1711_v31 }
 0x486   :  { %1156 = vmatprep.subr.mxu0 %v1867_v53 }
 0x487   :  { %1157 = vmatpush1.msra.mxu0 %v1899_v0 }
 0x488   :  { %1158 = vmatprep.subr.mxu0 %v1917_v5 }
 0x489   :  { %1159 = vmatpush1.msra.mxu0 %v1931_v9 }
 0x48a   :  { %1160 = vmatprep.subr.mxu0 %v1952_v15 }
 0x48b   :  { %1161 = vmatpush1.msra.mxu0 %v1994_v32 }
 0x48c   :  { %1162 = vmatprep.subr.mxu0 %v2004_v33 }
 0x48d   :  { %1163 = vmatpush1.msra.mxu0 %v2033_v41 }
 0x48e   :  { %1164 = vmatprep.subr.mxu0 %v2056_v49 }
 0x48f   :  { %1165 = vmatpush1.msra.mxu0 %v2069_v51 }
 0x490   :  { %1166 = vmatprep.subr.mxu0 %v2081_v55 }
 0x491   :  { %1167 = vmatpush1.msra.mxu0 %v2096_v60 }
 0x492   :  { %1168 = vmatprep.subr.mxu0 %v2122_v7 }
 0x493   :  { %1169 = vmatpush1.msra.mxu0 %v2160_v21 }
 0x494   :  { %1366 = vmatprep.subr.mxu0 %v1796_v22 }
 0x544   :  { %v992_v45 = vpop.f32.mrf.mxu0 }
 0x545   :  { %v997_v30 = vadd.f32 %v992_v45, %v2212_v44 }
 0x546   :  { %v994_v34 = vpop.f32.mrf.mxu0 }
 0x547   :  { %v1533_v35 = vmul.f32 -1.442695, %v997_v30  ;;  %v998_v36 = vadd.f32 %v994_v34, %v2214_v47 }
 0x549   :  { %1581 = vpow2.f32 %v1533_v35  ;;  %v1534_v46 = vmul.f32 -1.442695, %v998_v36 }
 0x54b   :  { %1583 = vpow2.f32 %v1534_v46 }
 0x54c   :  { %1585 = vtanh.f32 %v998_v36 }
 0x556   :  { %v1582_v48 = vpop.eup %1581 }
 0x557   :  { %v1007_v56 = vadd.f32 1.0, %v1582_v48 }
 0x558   :  { %v1584_v50 = vpop.eup %1583 }
 0x559   :  { %v1008_v57 = vadd.f32 1.0, %v1584_v50  ;;  %v1586_v59 = vpop.eup %1585 }
 0x55b   :  { %1587 = vrcp.f32 %v1008_v57 }
 0x55c   :  { %1589 = vrcp.f32 %v1007_v56 }
 0x568   :  { %v1588_v61 = vpop.eup %1587 }
 0x569   :  { %v1590_v22 = vpop.eup %1589  ;;  %v1014_v44 = vsel %vm675_vm11, %v1586_v59, %v1588_v61 }
 0x56a   :  { %v1016_v1 = vmul.f32 %v1590_v22, %v1014_v44  ;;  %v1015_v47 = vmul.f32 %v1590_v22, %v915_v29 }
 0x56c   :  { %1018 = vrot.lane.b32.xlu1 %v1016_v1, %s1710_s10 }
 0x5de   :  { %v1019_v3 = vpop.permute.xlu1 %1018 }
 0x5df   :  { %v1021_v4 = vadd.f32 %v1019_v3, %v1015_v47 }
 0x5e1   :  { %1591 = vtanh.f32 %v1021_v4 }
 0x5ee   :  { %v1592_v8 = vpop.eup %1591 }
 0x5ef   :  { %v1023_v10 = vmul.f32 %v1592_v8, %v1014_v44 }
 0x5f1   :  { %1028 = vrot.lane.b32.xlu0 %v1023_v10, %s1710_s10 }
 0x663   :  { %v1029_v12 = vpop.permute.xlu0 %1028 }
 0x664   :  { %1535 = vmatmul.mubr.msk.f32.vlgmr.msra.gmra.mxu1 %vm708_vm6, %v1029_v12 }
 0x665   :  { %1261 = vmatpush1.msra.mxu1 %v1857_v52  ;;  %1308 = vmatprep.mubr.f32.mxu1 %v1711_v31 }
 0x666   :  { %1262 = vmatprep.subr.mxu1 %v1867_v53 }
 0x667   :  { %1263 = vmatpush1.msra.mxu1 %v1899_v0 }
 0x668   :  { %1264 = vmatprep.subr.mxu1 %v1917_v5 }
 0x669   :  { %1265 = vmatpush1.msra.mxu1 %v1931_v9 }
 0x66a   :  { %1266 = vmatprep.subr.mxu1 %v1952_v15 }
 0x66b   :  { %1267 = vmatpush1.msra.mxu1 %v1994_v32 }
 0x66c   :  { %1268 = vmatprep.subr.mxu1 %v2004_v33 }
 0x66d   :  { %1269 = vmatpush1.msra.mxu1 %v2033_v41 }
 0x66e   :  { %1270 = vmatprep.subr.mxu1 %v2056_v49 }
 0x66f   :  { %1271 = vmatpush1.msra.mxu1 %v2069_v51 }
 0x670   :  { %1272 = vmatprep.subr.mxu1 %v2081_v55 }
 0x671   :  { %1273 = vmatpush1.msra.mxu1 %v2096_v60 }
 0x672   :  { %1274 = vmatprep.subr.mxu1 %v2122_v7 }
 0x673   :  { %1275 = vmatpush1.msra.mxu1 %v2160_v21 }
 0x724   :  { %v1098_v13 = vpop.f32.mrf.mxu1 }
 0x725   :  { %v1103_v17 = vadd.f32 %v1098_v13, %v2216_v54 }
 0x726   :  { %v1100_v18 = vpop.f32.mrf.mxu1 }
 0x727   :  { %v1536_v19 = vmul.f32 -1.442695, %v1103_v17  ;;  %v1104_v20 = vadd.f32 %v1100_v18, %v2218_v58 }
 0x729   :  { %1593 = vpow2.f32 %v1536_v19  ;;  %v1537_v28 = vmul.f32 -1.442695, %v1104_v20 }
 0x72b   :  { %1595 = vpow2.f32 %v1537_v28 }
 0x72c   :  { %1597 = vtanh.f32 %v1104_v20  ;;  %v656_v20 = vadd.f32 %v2255_v63, %v2230_v16 }
 0x736   :  { %v1594_v23 = vpop.eup %1593 }
 0x737   :  { %v1113_v38 = vadd.f32 1.0, %v1594_v23 }
 0x738   :  { %v1596_v37 = vpop.eup %1595 }
 0x739   :  { %v1114_v39 = vadd.f32 1.0, %v1596_v37  ;;  %v1598_v40 = vpop.eup %1597 }
 0x73b   :  { %1599 = vrcp.f32 %v1114_v39 }
 0x73c   :  { %1601 = vrcp.f32 %v1113_v38 }
 0x748   :  { %v1600_v24 = vpop.eup %1599 }
 0x749   :  { %v1602_v25 = vpop.eup %1601  ;;  %v1120_v54 = vsel %vm675_vm11, %v1598_v40, %v1600_v24 }
 0x74a   :  { %v1122_v29 = vmul.f32 %v1602_v25, %v1120_v54  ;;  %v1121_v58 = vmul.f32 %v1602_v25, %v1021_v4 }
 0x74c   :  { %1124 = vrot.lane.b32.xlu1 %v1122_v29, %s1710_s10 }
 0x7be   :  { %v1125_v27 = vpop.permute.xlu1 %1124 }
 0x7bf   :  { %v1127_v42 = vadd.f32 %v1125_v27, %v1121_v58 }
 0x7c1   :  { %1603 = vtanh.f32 %v1127_v42 }
 0x7ce   :  { %v1604_v43 = vpop.eup %1603 }
 0x7cf   :  { %v1129_v45 = vmul.f32 %v1604_v43, %v1120_v54 }
 0x7d1   :  { %1134 = vrot.lane.b32.xlu0 %v1129_v45, %s1710_s10 }
 0x843   :  { %v1135_v30 = vpop.permute.xlu0 %1134 }
 0x844   :  { %1538 = vmatmul.mubr.msk.f32.vlgmr.msra.gmra.mxu0 %vm708_vm6, %v1135_v30 }
 0x845   :  { %1367 = vmatpush1.msra.mxu0 %v1857_v52  ;;  %1414 = vmatprep.mubr.f32.mxu0 %v1711_v31 }
 0x846   :  { %1368 = vmatprep.subr.mxu0 %v1867_v53 }
 0x847   :  { %1369 = vmatpush1.msra.mxu0 %v1899_v0 }
 0x848   :  { %1370 = vmatprep.subr.mxu0 %v1917_v5 }
 0x849   :  { %1371 = vmatpush1.msra.mxu0 %v1931_v9 }
 0x84a   :  { %1372 = vmatprep.subr.mxu0 %v1952_v15 }
 0x84b   :  { %1373 = vmatpush1.msra.mxu0 %v1994_v32 }
 0x84c   :  { %1374 = vmatprep.subr.mxu0 %v2004_v33 }
 0x84d   :  { %1375 = vmatpush1.msra.mxu0 %v2033_v41 }
 0x84e   :  { %1376 = vmatprep.subr.mxu0 %v2056_v49 }
 0x84f   :  { %1377 = vmatpush1.msra.mxu0 %v2069_v51 }
 0x850   :  { %1378 = vmatprep.subr.mxu0 %v2081_v55 }
 0x851   :  { %1379 = vmatpush1.msra.mxu0 %v2096_v60 }
 0x852   :  { %1380 = vmatprep.subr.mxu0 %v2122_v7 }
 0x853   :  { %1381 = vmatpush1.msra.mxu0 %v2160_v21 }
 0x904   :  { %v1204_v31 = vpop.f32.mrf.mxu0 }
 0x905   :  { %v1209_v52 = vadd.f32 %v1204_v31, %v2220_v62 }
 0x906   :  { %v1206_v53 = vpop.f32.mrf.mxu0 }
 0x907   :  { %v1539_v0 = vmul.f32 -1.442695, %v1209_v52  ;;  %v1210_v5 = vadd.f32 %v1206_v53, %v2222_v2 }
 0x909   :  { %1605 = vpow2.f32 %v1539_v0  ;;  %v1540_v9 = vmul.f32 -1.442695, %v1210_v5 }
 0x90b   :  { %1607 = vpow2.f32 %v1540_v9 }
 0x90c   :  { %1609 = vtanh.f32 %v1210_v5 }
 0x916   :  { %v1606_v15 = vpop.eup %1605 }
 0x917   :  { %v1219_v33 = vadd.f32 1.0, %v1606_v15 }
 0x918   :  { %v1608_v32 = vpop.eup %1607 }
 0x919   :  { %v1220_v41 = vadd.f32 1.0, %v1608_v32  ;;  %v1610_v49 = vpop.eup %1609 }
 0x91b   :  { %1611 = vrcp.f32 %v1220_v41 }
 0x91c   :  { %1613 = vrcp.f32 %v1219_v33 }
 0x928   :  { %v1612_v51 = vpop.eup %1611 }
 0x929   :  { %v1614_v55 = vpop.eup %1613  ;;  %v1226_v60 = vsel %vm675_vm11, %v1610_v49, %v1612_v51 }
 0x92a   :  { %v1228_v7 = vmul.f32 %v1614_v55, %v1226_v60  ;;  %v1227_v21 = vmul.f32 %v1614_v55, %v1127_v42 }
 0x92c   :  { %1230 = vrot.lane.b32.xlu1 %v1228_v7, %s1710_s10 }
 0x99e   :  { %v1231_v62 = vpop.permute.xlu1 %1230 }
 0x99f   :  { %v1233_v2 = vadd.f32 %v1231_v62, %v1227_v21 }
 0x9a1   :  { %1615 = vtanh.f32 %v1233_v2 }
 0x9ae   :  { %v1616_v34 = vpop.eup %1615 }
 0x9af   :  { %v1235_v35 = vmul.f32 %v1616_v34, %v1226_v60 }
 0x9b1   :  { %1240 = vrot.lane.b32.xlu0 %v1235_v35, %s1710_s10 }
 0xa23   :  { %v1241_v36 = vpop.permute.xlu0 %1240 }
 0xa24   :  { %1541 = vmatmul.mubr.msk.f32.vlgmr.msra.gmra.mxu1 %vm708_vm6, %v1241_v36 }
 0xae4   :  { %v1310_v46 = vpop.f32.mrf.mxu1 }
 0xae5   :  { %v1315_v48 = vadd.f32 %v1310_v46, %v2224_v6 }
 0xae6   :  { %v1312_v50 = vpop.f32.mrf.mxu1 }
 0xae7   :  { %v1542_v56 = vmul.f32 -1.442695, %v1315_v48  ;;  %v1316_v57 = vadd.f32 %v1312_v50, %v2226_v11 }
 0xae9   :  { %1617 = vpow2.f32 %v1542_v56  ;;  %v1543_v59 = vmul.f32 -1.442695, %v1316_v57 }
 0xaeb   :  { %1619 = vpow2.f32 %v1543_v59 }
 0xaec   :  { %1621 = vtanh.f32 %v1316_v57 }
 0xaf6   :  { %v1618_v61 = vpop.eup %1617 }
 0xaf7   :  { %v1325_v44 = vadd.f32 1.0, %v1618_v61 }
 0xaf8   :  { %v1620_v22 = vpop.eup %1619 }
 0xaf9   :  { %v1326_v1 = vadd.f32 1.0, %v1620_v22  ;;  %v1622_v47 = vpop.eup %1621 }
 0xafb   :  { %1623 = vrcp.f32 %v1326_v1 }
 0xafc   :  { %1625 = vrcp.f32 %v1325_v44 }
 0xb08   :  { %v1624_v3 = vpop.eup %1623 }
 0xb09   :  { %v1626_v4 = vpop.eup %1625  ;;  %v1332_v6 = vsel %vm675_vm11, %v1622_v47, %v1624_v3 }
 0xb0a   :  { %v1334_v8 = vmul.f32 %v1626_v4, %v1332_v6  ;;  %v1333_v11 = vmul.f32 %v1626_v4, %v1233_v2 }
 0xb0c   :  { %1336 = vrot.lane.b32.xlu1 %v1334_v8, %s1710_s10 }
 0xb7e   :  { %v1337_v10 = vpop.permute.xlu1 %1336 }
 0xb7f   :  { %v1339_v12 = vadd.f32 %v1337_v10, %v1333_v11 }
 0xb81   :  { %1627 = vtanh.f32 %v1339_v12 }
 0xb8e   :  { %v1628_v13 = vpop.eup %1627 }
 0xb8f   :  { %v1341_v17 = vmul.f32 %v1628_v13, %v1332_v6 }
 0xb91   :  { %1346 = vrot.lane.b32.xlu0 %v1341_v17, %s1710_s10 }
 0xc03   :  { %v1347_v18 = vpop.permute.xlu0 %1346 }
 0xc04   :  { %1544 = vmatmul.mubr.msk.f32.vlgmr.msra.gmra.mxu0 %vm708_vm6, %v1347_v18 }
 0xcc4   :  { %v1416_v19 = vpop.f32.mrf.mxu0 }
 0xcc5   :  { %v1421_v28 = vadd.f32 %v1416_v19, %v2228_v14 }
 0xcc6   :  { %v1418_v23 = vpop.f32.mrf.mxu0 }
 0xcc7   :  { %v1545_v37 = vmul.f32 -1.442695, %v1421_v28  ;;  %v1422_v38 = vadd.f32 %v1418_v23, %v656_v20 }
 0xcc9   :  { %1629 = vpow2.f32 %v1545_v37  ;;  %v1546_v39 = vmul.f32 -1.442695, %v1422_v38 }
 0xccb   :  { %1631 = vpow2.f32 %v1546_v39 }
 0xccc   :  { %1633 = vtanh.f32 %v1422_v38 }
 0xcd6   :  { %v1630_v40 = vpop.eup %1629 }
 0xcd7   :  { %v1431_v25 = vadd.f32 1.0, %v1630_v40 }
 0xcd8   :  { %v1632_v24 = vpop.eup %1631 }
 0xcd9   :  { %v1432_v54 = vadd.f32 1.0, %v1632_v24  ;;  %v1634_v29 = vpop.eup %1633 }
 0xcdb   :  { %1635 = vrcp.f32 %v1432_v54 }
 0xcdc   :  { %1637 = vrcp.f32 %v1431_v25 }
 0xce8   :  { %v1636_v58 = vpop.eup %1635 }
 0xce9   :  { %v1638_v27 = vpop.eup %1637  ;;  %v1438_v16 = vsel %vm675_vm11, %v1634_v29, %v1636_v58 }
 0xcea   :  { %v1440_v14 = vmul.f32 %v1638_v27, %v1438_v16  ;;  %v1439_v63 = vmul.f32 %v1638_v27, %v1339_v12 }
 0xcec   :  { %1442 = vrot.lane.b32.xlu1 %v1440_v14, %s1710_s10 }
 0xd5e   :  { %v1443_v42 = vpop.permute.xlu1 %1442 }
 0xd5f   :  { %v1445_v43 = vadd.f32 %v1443_v42, %v1439_v63 }
 0xd61   :  { %1447 = vrot.lane.b32.xlu0 %v1445_v43, %s1710_s10 }
 0xdd3   :  { %v1448_v45 = vpop.permute.xlu0 %1447 }
 0xdd4   :  { %v1450_v30 = vsel %vm708_vm6, %v1448_v45, 0.0 }
 0xdd5   :  { %1451 = vst [vmem:[#allocation8] sm:$0xff] %v1450_v30 }
 0xdd6   :  { %1690 = shalt.err (!%p1687_p0)
}
 0xdd7   :  { %1461 = dma.vmem_to_hbm [thread:$0]  %s1459_s12, 128, %s2360_s6, [#allocation5]  }
 0xdd8   :  { %1703 = dma.done.wait [#allocation5], 128  }
 0xdd9   :  { %1704 = vsyncadd [#allocation5], 4294967168 }
 0xdda   :  { %1465 = vsyncpa [#allocation4], 1 }
 0xddb   :  { %1466 = vsyncpa [#allocation7], 1 }
 0xddc   :  { %1467 = vsyncpa [#allocation5], 1 }

</bundles_post_ra>
